<compile_context>
chip_gen: v5e
topology: v5e:2x2
jax: 0.10.0
libtpu: 0.0.40
codegen_flags: <defaults>
</compile_context>

<pallas_src>
import jax
import jax.numpy as jnp
from jax.experimental import pallas as pl
from jax.experimental.pallas import tpu as pltpu

FC_PAD = 128       # lane-padded width of the final Linear output
TIME_CHUNK = 128   # timesteps streamed per grid step (double-buffered by BlockSpec)
B_BLK = 128        # batch lanes per block (feature-major layout: batch lives on lanes)


def rnn_kernel(maxlen_ref,                     # SMEM (1,) i32   scalar-prefetch: max(lns)
               p0_ref,                         # (tc, H, Bb) bf16  hoisted x@Wih0+b0, feature-major
               lns_ref,                        # (1, Bb)  i32
               whh0_ref,                       # (H, H)   bf16    whh0^T
               w1cat_ref,                      # (H, 2H)  bf16    [wih1^T | whh1^T]
               b1_ref,                         # (H, 1)   f32
               wfc_ref, bfc_ref,               # (FC_PAD, H) / (FC_PAD, 1) f32
               out_ref,                        # (FC_PAD, Bb) f32
               h0_sc, h1_sc, sel_sc):          # VMEM (H, Bb) f32 scratch
    tc, H, Bb = p0_ref.shape
    t_chunk = pl.program_id(1)
    n_chunks = pl.num_programs(1)
    t0 = t_chunk * tc

    @pl.when(t_chunk == 0)
    def _init():
        h0_sc[...] = jnp.zeros_like(h0_sc)
        h1_sc[...] = jnp.zeros_like(h1_sc)
        sel_sc[...] = jnp.zeros_like(sel_sc)

    # skip fully-dead chunks (all timesteps >= max(lns)); within a live chunk the
    # static loop may run past max_len -- safe because the output is gated on last_t
    # and the hidden states are never exported.
    @pl.when(t0 < maxlen_ref[0])
    def _chunk():
        whh0 = whh0_ref[...]                                   # (H, H)  bf16
        w1cat = w1cat_ref[...]                                 # (H, 2H) bf16
        # hoist the bias broadcast out of the loop (no CSE of broadcast_in_dim in-loop)
        b1 = jnp.broadcast_to(b1_ref[...], (H, Bb))            # (H, Bb) f32
        last_t = lns_ref[...] - 1                              # (1, Bb) i32

        def step(i, carry):
            h0, h1, sel = carry                                # f32 (H, Bb)
            x_t = p0_ref[i]                                    # bf16 (H, Bb)
            # layer 0: input projection already applied; bf16 MXU, f32 accumulate
            h0 = jnp.tanh(x_t.astype(jnp.float32)
                          + jnp.dot(whh0, h0.astype(jnp.bfloat16),
                                    preferred_element_type=jnp.float32))
            # layer 1 (eval-mode: no inter-layer dropout): fused K=2H matmul over
            # the fresh h0 and the previous h1.
            cat = jnp.concatenate([h0.astype(jnp.bfloat16),
                                   h1.astype(jnp.bfloat16)], axis=0)   # (2H, Bb)
            h1 = jnp.tanh(jnp.dot(w1cat, cat,
                                  preferred_element_type=jnp.float32) + b1)
            # capture the top-layer output at each example's last valid timestep
            sel = jnp.where(last_t == t0 + i, h1, sel)
            return h0, h1, sel

        # static trip count + unrolling lets the LLO scheduler overlap the
        # independent work of step i with the MXU pushes of step i+1.
        h0, h1, sel = jax.lax.fori_loop(
            0, tc, step, (h0_sc[...], h1_sc[...], sel_sc[...]),
            unroll=min(8, tc))
        h0_sc[...] = h0
        h1_sc[...] = h1
        sel_sc[...] = sel

    @pl.when(t_chunk == n_chunks - 1)
    def _finalize():
        # eval-mode dropout == identity; fc1 with lane-padded weights, lane-dense out
        out_ref[...] = (jnp.dot(wfc_ref[...], sel_sc[...],
                                preferred_element_type=jnp.float32)
                        + bfc_ref[...])


@jax.jit
def rnn_forward(tokens, lns, mask, p):
    """JAX wrapper mirroring RNN.forward(x, lns, mask) in eval mode."""
    B, T = tokens.shape
    H = p["whh0"].shape[0]

    # 1) frozen embedding lookup (padding_idx row is zero) -- plain JAX glue
    x_emb = p["emb"][tokens]                                     # (B, T, E)
    # matches `lengths = mask.sum(1)` used only for packing in the torch code
    _lengths = mask.sum(axis=1).astype(jnp.int32)

    # 2) hoisted layer-0 input projection for ALL timesteps as one large matmul,
    #    emitted feature-major (T, H, B) so in-kernel tiles are lane-dense.
    p0 = (jnp.einsum("bte,eh->thb", x_emb, p["wih0"])
          + p["b0"].reshape(1, H, 1)).astype(jnp.bfloat16)       # (T, H, B) bf16

    # pack_padded_sequence requires lengths >= 1; also clamp to <= T
    lns_c = jnp.clip(lns.astype(jnp.int32), 1, T)
    max_len = jnp.max(lns_c).reshape(1)                          # scalar-prefetch operand

    # batch padded to 128 lanes; on v7x the "parallel" batch-block axis shards the
    # two TensorCores whenever B > 128 (below that, splitting would break lane density)
    B_pad = ((B + B_BLK - 1) // B_BLK) * B_BLK
    nb = B_pad // B_BLK

    # pad time to a multiple of the streamed chunk (dead chunks are skipped in-kernel)
    tc = min(TIME_CHUNK, T)
    nt = (T + tc - 1) // tc
    T_pad = nt * tc

    p0 = jnp.pad(p0, ((0, T_pad - T), (0, 0), (0, B_pad - B)))
    lns_k = jnp.pad(lns_c, (0, B_pad - B), constant_values=1).reshape(1, B_pad)

    # feature-major weights; recurrent weights in bf16 (f32 accumulation in-kernel)
    whh0_t = p["whh0"].T.astype(jnp.bfloat16)                              # (H, H)
    w1cat_t = jnp.concatenate([p["wih1"].T, p["whh1"].T],
                              axis=1).astype(jnp.bfloat16)                 # (H, 2H)
    b1_t = p["b1"].T                                                       # (H, 1)
    wfc_t = p["wfc_pad"].T                                                 # (FC_PAD, H)
    bfc_t = p["bfc_pad"].T                                                 # (FC_PAD, 1)

    flops = T_pad * B_pad * 6 * H * H + 2 * B_pad * H * FC_PAD
    transcendentals = 2 * T_pad * B_pad * H
    bytes_accessed = (p0.size * 2                                 # bf16 P0 stream
                      + 2 * (H * H + 2 * H * H)                   # bf16 recurrent weights
                      + 4 * (H + H * FC_PAD + FC_PAD)             # f32 bias / fc weights
                      + 4 * B_pad + 4 * FC_PAD * B_pad)           # lns + output

    grid_spec = pltpu.PrefetchScalarGridSpec(
        num_scalar_prefetch=1,
        grid=(nb, nt),                                            # (batch blocks, time chunks)
        in_specs=[
            pl.BlockSpec((tc, H, B_BLK), lambda b, t, ml: (t, 0, b)),   # P0 stream
            pl.BlockSpec((1, B_BLK), lambda b, t, ml: (0, b)),          # lns (lane vector)
            pl.BlockSpec((H, H), lambda b, t, ml: (0, 0)),              # whh0^T
            pl.BlockSpec((H, 2 * H), lambda b, t, ml: (0, 0)),          # [wih1^T | whh1^T]
            pl.BlockSpec((H, 1), lambda b, t, ml: (0, 0)),              # b1
            pl.BlockSpec((FC_PAD, H), lambda b, t, ml: (0, 0)),         # fc1 weight (padded)
            pl.BlockSpec((FC_PAD, 1), lambda b, t, ml: (0, 0)),         # fc1 bias (padded)
        ],
        out_specs=pl.BlockSpec((FC_PAD, B_BLK), lambda b, t, ml: (0, b)),
        scratch_shapes=[pltpu.VMEM((H, B_BLK), jnp.float32)] * 3,       # h0, h1, sel
    )

    out_padded = pl.pallas_call(
        rnn_kernel,
        out_shape=jax.ShapeDtypeStruct((FC_PAD, B_pad), jnp.float32),
        grid_spec=grid_spec,
        compiler_params=pltpu.CompilerParams(
            # batch blocks independent (megacore on v7x); time is a serial recurrence.
            # Per-chunk VMEM (~2 MiB double-buffered) fits default scoped limits on
            # v5e/v6e (16/32 MiB) and v7x (32 MiB).
            dimension_semantics=("parallel", "arbitrary")),
        cost_estimate=pl.CostEstimate(flops=flops,
                                      transcendentals=transcendentals,
                                      bytes_accessed=bytes_accessed),
    )(max_len, p0, lns_k, whh0_t, w1cat_t, b1_t, wfc_t, bfc_t)

    return out_padded[:2, :B].T                                  # (B, 2) == fc1 output


def ref_forward(tokens, lns, mask, p):
    """Pure-JAX f32 reference (eval-mode PyTorch semantics)."""
    x = p["emb"][tokens]                           # (B, T, E)
    B, T, _ = x.shape
    H = p["whh0"].shape[0]
    h0 = jnp.zeros((B, H), jnp.float32)
    h1 = jnp.zeros((B, H), jnp.float32)
    outs = []
    for t in range(T):
        h0 = jnp.tanh(x[:, t] @ p["wih0"] + h0 @ p["whh0"] + p["b0"])
        h1 = jnp.tanh(h0 @ p["wih1"] + h1 @ p["whh1"] + p["b1"])
        outs.append(h1)
    outs = jnp.stack(outs, axis=1)                 # (B, T, H)
    sel = outs[jnp.arange(B), lns - 1]             # gather at last valid step
    return sel @ p["wfc_pad"][:, :2] + p["bfc_pad"][0, :2]


def init_params(key, vocab, E, H):
    ks = jax.random.split(key, 12)
    s_rnn = 1.0 / jnp.sqrt(H)
    s_fc = 1.0 / jnp.sqrt(H)
    emb = jax.random.normal(ks[0], (vocab, E), jnp.float32) * 0.1
    emb = emb.at[0].set(0.0)                       # padding_idx=0 row is zero

    def u(k, shape, s):
        return jax.random.uniform(k, shape, jnp.float32, -s, s)

    # PyTorch nn.RNN: weight_ih_l0 (H,E), weight_hh_l0 (H,H), biases (H,)
    wih0 = u(ks[1], (E, H), s_rnn)                 # stored transposed (x @ W convention)
    whh0 = u(ks[2], (H, H), s_rnn)
    b0 = (u(ks[3], (H,), s_rnn) + u(ks[4], (H,), s_rnn)).reshape(1, H)
    wih1 = u(ks[5], (H, H), s_rnn)
    whh1 = u(ks[6], (H, H), s_rnn)
    b1 = (u(ks[7], (H,), s_rnn) + u(ks[8], (H,), s_rnn)).reshape(1, H)

    # fc1: Linear(H, 2) — lane-pad weight^T / bias to 128 for a dense out_spec
    wfc = u(ks[9], (H, 2), s_fc)
    bfc = u(ks[10], (2,), s_fc)
    wfc_pad = jnp.zeros((H, FC_PAD), jnp.float32).at[:, :2].set(wfc)
    bfc_pad = jnp.zeros((1, FC_PAD), jnp.float32).at[0, :2].set(bfc)

    return dict(emb=emb, wih0=wih0, whh0=whh0, b0=b0,
                wih1=wih1, whh1=whh1, b1=b1,
                wfc_pad=wfc_pad, bfc_pad=bfc_pad)


if __name__ == "__main__":
    key = jax.random.PRNGKey(0)
    vocab, E, H = 50, 32, 32
    B, T = 4, 8

    k_par, k_tok = jax.random.split(key)
    params = init_params(k_par, vocab, E, H)

    lns = jnp.array([8, 5, 3, 6], dtype=jnp.int32)                  # per-example lengths
    pos = jnp.arange(T)[None, :]
    mask = (pos < lns[:, None]).astype(jnp.float32)                 # (B, T)
    tokens = jax.random.randint(k_tok, (B, T), 1, vocab, jnp.int32)
    tokens = jnp.where(mask > 0, tokens, 0)                         # pad with padding_idx=0

    out = jax.block_until_ready(rnn_forward(tokens, lns, mask, params))
    ref = ref_forward(tokens, lns, mask, params)

    assert out.shape == (B, 2)
    # bf16 input-projection stream + bf16 recurrent weights -> loosened tolerance vs f32 ref
    assert jnp.allclose(out, ref, rtol=3e-2, atol=3e-2), (out, ref)
    print("KERNEL_OK")
</pallas_src>

<mosaic_0001>
module attributes {stable_mosaic.version = 11 : i64} {
  func.func @rnn_kernel(%arg0: i32, %arg1: i32, %arg2: memref<1xi32, #tpu.memory_space<smem>>, %arg3: memref<8x32x128xbf16, #tpu.memory_space<vmem>>, %arg4: memref<1x128xi32, #tpu.memory_space<vmem>>, %arg5: memref<32x32xbf16, #tpu.memory_space<vmem>>, %arg6: memref<32x64xbf16, #tpu.memory_space<vmem>>, %arg7: memref<32x1xf32, #tpu.memory_space<vmem>>, %arg8: memref<128x32xf32, #tpu.memory_space<vmem>>, %arg9: memref<128x1xf32, #tpu.memory_space<vmem>>, %arg10: memref<128x128xf32, #tpu.memory_space<vmem>>, %arg11: memref<32x128xf32, #tpu.memory_space<vmem>>, %arg12: memref<32x128xf32, #tpu.memory_space<vmem>>, %arg13: memref<32x128xf32, #tpu.memory_space<vmem>>) attributes {dimension_semantics = [#tpu.dimension_semantics<parallel>, #tpu.dimension_semantics<arbitrary>], iteration_bounds = array<i64: 1, 1>, scalar_prefetch = 1 : i64, scratch_operands = 3 : i64, tpu.core_type = #tpu.core_type<tc>, window_params = [{transform_indices = @transform_0, window_bounds = array<i64: 8, 32, 128>}, {transform_indices = @transform_1, window_bounds = array<i64: 1, 128>}, {pipeline_mode = #tpu.pipeline_mode<synchronous>, transform_indices = @transform_2, window_bounds = array<i64: 32, 32>}, {pipeline_mode = #tpu.pipeline_mode<synchronous>, transform_indices = @transform_3, window_bounds = array<i64: 32, 64>}, {pipeline_mode = #tpu.pipeline_mode<synchronous>, transform_indices = @transform_4, window_bounds = array<i64: 32, 1>}, {pipeline_mode = #tpu.pipeline_mode<synchronous>, transform_indices = @transform_5, window_bounds = array<i64: 128, 32>}, {pipeline_mode = #tpu.pipeline_mode<synchronous>, transform_indices = @transform_6, window_bounds = array<i64: 128, 1>}, {transform_indices = @transform_7, window_bounds = array<i64: 128, 128>}]} {
    %c8_i32 = arith.constant 8 : i32
    %0 = arith.muli %arg1, %c8_i32 : i32
    %c0_i32 = arith.constant 0 : i32
    %1 = arith.cmpi eq, %arg1, %c0_i32 : i32
    %2 = arith.extui %1 : i1 to i32
    %c0_i32_0 = arith.constant 0 : i32
    %3 = arith.cmpi ne, %2, %c0_i32_0 : i32
    scf.if %3 {
      %cst = arith.constant 0.000000e+00 : f32
      %11 = vector.broadcast %cst : f32 to vector<32x128xf32>
      %c0_4 = arith.constant 0 : index
      %c0_5 = arith.constant 0 : index
      %12 = vector.load %arg11[%c0_4, %c0_5] : memref<32x128xf32, #tpu.memory_space<vmem>>, vector<32x128xf32>
      tpu.vector_store %arg11[%c0_4, %c0_5], %11 {strides = array<i32>} : memref<32x128xf32, #tpu.memory_space<vmem>>, vector<32x128xf32>,
      %cst_6 = arith.constant 0.000000e+00 : f32
      %13 = vector.broadcast %cst_6 : f32 to vector<32x128xf32>
      %c0_7 = arith.constant 0 : index
      %c0_8 = arith.constant 0 : index
      %14 = vector.load %arg12[%c0_7, %c0_8] : memref<32x128xf32, #tpu.memory_space<vmem>>, vector<32x128xf32>
      tpu.vector_store %arg12[%c0_7, %c0_8], %13 {strides = array<i32>} : memref<32x128xf32, #tpu.memory_space<vmem>>, vector<32x128xf32>,
      %cst_9 = arith.constant 0.000000e+00 : f32
      %15 = vector.broadcast %cst_9 : f32 to vector<32x128xf32>
      %c0_10 = arith.constant 0 : index
      %c0_11 = arith.constant 0 : index
      %16 = vector.load %arg13[%c0_10, %c0_11] : memref<32x128xf32, #tpu.memory_space<vmem>>, vector<32x128xf32>
      tpu.vector_store %arg13[%c0_10, %c0_11], %15 {strides = array<i32>} : memref<32x128xf32, #tpu.memory_space<vmem>>, vector<32x128xf32>,
    } else {
    }
    %c0 = arith.constant 0 : index
    %4 = memref.load %arg2[%c0] : memref<1xi32, #tpu.memory_space<smem>>
    %5 = arith.cmpi slt, %0, %4 : i32
    %6 = arith.extui %5 : i1 to i32
    %c0_i32_1 = arith.constant 0 : i32
    %7 = arith.cmpi ne, %6, %c0_i32_1 : i32
    scf.if %7 {
      %c0_4 = arith.constant 0 : index
      %c0_5 = arith.constant 0 : index
      %11 = vector.load %arg5[%c0_4, %c0_5] : memref<32x32xbf16, #tpu.memory_space<vmem>>, vector<32x32xbf16>
      %c0_6 = arith.constant 0 : index
      %c0_7 = arith.constant 0 : index
      %12 = vector.load %arg6[%c0_6, %c0_7] : memref<32x64xbf16, #tpu.memory_space<vmem>>, vector<32x64xbf16>
      %c0_8 = arith.constant 0 : index
      %c0_9 = arith.constant 0 : index
      %13 = vector.load %arg7[%c0_8, %c0_9] : memref<32x1xf32, #tpu.memory_space<vmem>>, vector<32x1xf32>
      %14 = vector.shape_cast %13 : vector<32x1xf32> to vector<32x1xf32>
      %15 = vector.broadcast %14 : vector<32x1xf32> to vector<32x128xf32>
      %c0_10 = arith.constant 0 : index
      %c0_11 = arith.constant 0 : index
      %16 = vector.load %arg4[%c0_10, %c0_11] : memref<1x128xi32, #tpu.memory_space<vmem>>, vector<1x128xi32>
      %c1_i32 = arith.constant 1 : i32
      %17 = vector.broadcast %c1_i32 : i32 to vector<1x128xi32>
      %18 = arith.subi %16, %17 : vector<1x128xi32>
      %c0_12 = arith.constant 0 : index
      %c0_13 = arith.constant 0 : index
      %19 = vector.load %arg11[%c0_12, %c0_13] : memref<32x128xf32, #tpu.memory_space<vmem>>, vector<32x128xf32>
      %c0_14 = arith.constant 0 : index
      %c0_15 = arith.constant 0 : index
      %20 = vector.load %arg12[%c0_14, %c0_15] : memref<32x128xf32, #tpu.memory_space<vmem>>, vector<32x128xf32>
      %c0_16 = arith.constant 0 : index
      %c0_17 = arith.constant 0 : index
      %21 = vector.load %arg13[%c0_16, %c0_17] : memref<32x128xf32, #tpu.memory_space<vmem>>, vector<32x128xf32>
      %c0_i32_18 = arith.constant 0 : i32
      %22 = arith.index_cast %c0_i32_18 : i32 to index
      %c0_19 = arith.constant 0 : index
      %c0_20 = arith.constant 0 : index
      %23 = vector.load %arg3[%22, %c0_19, %c0_20] : memref<8x32x128xbf16, #tpu.memory_space<vmem>>, vector<1x32x128xbf16>
      %24 = vector.shape_cast %23 : vector<1x32x128xbf16> to vector<32x128xbf16>
      %25 = arith.extf %24 : vector<32x128xbf16> to vector<32x128xf32>
      %26 = arith.truncf %19 : vector<32x128xf32> to vector<32x128xbf16>
      %cst = arith.constant dense<0.000000e+00> : vector<32x128xf32>
      %27 = tpu.matmul %11, %26, %cst {dimension_numbers = #tpu.dot_dimension_numbers<[1], [0], [0], [1], [0, 0, 1, 1], [], []>} : vector<32x32xbf16>, vector<32x128xbf16>, vector<32x128xf32> -> vector<32x128xf32>
      %28 = arith.addf %25, %27 : vector<32x128xf32>
      %29 = math.tanh %28 : vector<32x128xf32>
      %30 = arith.truncf %29 : vector<32x128xf32> to vector<32x128xbf16>
      %31 = arith.truncf %20 : vector<32x128xf32> to vector<32x128xbf16>
      %32 = tpu.concatenate %30, %31 in 0 : vector<32x128xbf16>, vector<32x128xbf16> -> vector<64x128xbf16>
      %cst_21 = arith.constant dense<0.000000e+00> : vector<32x128xf32>
      %33 = tpu.matmul %12, %32, %cst_21 {dimension_numbers = #tpu.dot_dimension_numbers<[1], [0], [0], [1], [0, 0, 1, 1], [], []>} : vector<32x64xbf16>, vector<64x128xbf16>, vector<32x128xf32> -> vector<32x128xf32>
      %34 = arith.addf %33, %15 : vector<32x128xf32>
      %35 = math.tanh %34 : vector<32x128xf32>
      %36 = arith.addi %0, %c0_i32_18 : i32
      %37 = vector.broadcast %36 : i32 to vector<1x128xi32>
      %38 = arith.cmpi eq, %18, %37 : vector<1x128xi32>
      %39 = vector.shape_cast %38 : vector<1x128xi1> to vector<1x128xi1>
      %40 = vector.broadcast %39 : vector<1x128xi1> to vector<32x128xi1>
      %41 = arith.select %40, %35, %21 : vector<32x128xi1>, vector<32x128xf32>
      %c1_i32_22 = arith.constant 1 : i32
      %42 = arith.index_cast %c1_i32_22 : i32 to index
      %c0_23 = arith.constant 0 : index
      %c0_24 = arith.constant 0 : index
      %43 = vector.load %arg3[%42, %c0_23, %c0_24] : memref<8x32x128xbf16, #tpu.memory_space<vmem>>, vector<1x32x128xbf16>
      %44 = vector.shape_cast %43 : vector<1x32x128xbf16> to vector<32x128xbf16>
      %45 = arith.extf %44 : vector<32x128xbf16> to vector<32x128xf32>
      %46 = arith.truncf %29 : vector<32x128xf32> to vector<32x128xbf16>
      %cst_25 = arith.constant dense<0.000000e+00> : vector<32x128xf32>
      %47 = tpu.matmul %11, %46, %cst_25 {dimension_numbers = #tpu.dot_dimension_numbers<[1], [0], [0], [1], [0, 0, 1, 1], [], []>} : vector<32x32xbf16>, vector<32x128xbf16>, vector<32x128xf32> -> vector<32x128xf32>
      %48 = arith.addf %45, %47 : vector<32x128xf32>
      %49 = math.tanh %48 : vector<32x128xf32>
      %50 = arith.truncf %49 : vector<32x128xf32> to vector<32x128xbf16>
      %51 = arith.truncf %35 : vector<32x128xf32> to vector<32x128xbf16>
      %52 = tpu.concatenate %50, %51 in 0 : vector<32x128xbf16>, vector<32x128xbf16> -> vector<64x128xbf16>
      %cst_26 = arith.constant dense<0.000000e+00> : vector<32x128xf32>
      %53 = tpu.matmul %12, %52, %cst_26 {dimension_numbers = #tpu.dot_dimension_numbers<[1], [0], [0], [1], [0, 0, 1, 1], [], []>} : vector<32x64xbf16>, vector<64x128xbf16>, vector<32x128xf32> -> vector<32x128xf32>
      %54 = arith.addf %53, %15 : vector<32x128xf32>
      %55 = math.tanh %54 : vector<32x128xf32>
      %56 = arith.addi %0, %c1_i32_22 : i32
      %57 = vector.broadcast %56 : i32 to vector<1x128xi32>
      %58 = arith.cmpi eq, %18, %57 : vector<1x128xi32>
      %59 = vector.shape_cast %58 : vector<1x128xi1> to vector<1x128xi1>
      %60 = vector.broadcast %59 : vector<1x128xi1> to vector<32x128xi1>
      %61 = arith.select %60, %55, %41 : vector<32x128xi1>, vector<32x128xf32>
      %c2_i32 = arith.constant 2 : i32
      %62 = arith.index_cast %c2_i32 : i32 to index
      %c0_27 = arith.constant 0 : index
      %c0_28 = arith.constant 0 : index
      %63 = vector.load %arg3[%62, %c0_27, %c0_28] : memref<8x32x128xbf16, #tpu.memory_space<vmem>>, vector<1x32x128xbf16>
      %64 = vector.shape_cast %63 : vector<1x32x128xbf16> to vector<32x128xbf16>
      %65 = arith.extf %64 : vector<32x128xbf16> to vector<32x128xf32>
      %66 = arith.truncf %49 : vector<32x128xf32> to vector<32x128xbf16>
      %cst_29 = arith.constant dense<0.000000e+00> : vector<32x128xf32>
      %67 = tpu.matmul %11, %66, %cst_29 {dimension_numbers = #tpu.dot_dimension_numbers<[1], [0], [0], [1], [0, 0, 1, 1], [], []>} : vector<32x32xbf16>, vector<32x128xbf16>, vector<32x128xf32> -> vector<32x128xf32>
      %68 = arith.addf %65, %67 : vector<32x128xf32>
      %69 = math.tanh %68 : vector<32x128xf32>
      %70 = arith.truncf %69 : vector<32x128xf32> to vector<32x128xbf16>
      %71 = arith.truncf %55 : vector<32x128xf32> to vector<32x128xbf16>
      %72 = tpu.concatenate %70, %71 in 0 : vector<32x128xbf16>, vector<32x128xbf16> -> vector<64x128xbf16>
      %cst_30 = arith.constant dense<0.000000e+00> : vector<32x128xf32>
      %73 = tpu.matmul %12, %72, %cst_30 {dimension_numbers = #tpu.dot_dimension_numbers<[1], [0], [0], [1], [0, 0, 1, 1], [], []>} : vector<32x64xbf16>, vector<64x128xbf16>, vector<32x128xf32> -> vector<32x128xf32>
      %74 = arith.addf %73, %15 : vector<32x128xf32>
      %75 = math.tanh %74 : vector<32x128xf32>
      %76 = arith.addi %0, %c2_i32 : i32
      %77 = vector.broadcast %76 : i32 to vector<1x128xi32>
      %78 = arith.cmpi eq, %18, %77 : vector<1x128xi32>
      %79 = vector.shape_cast %78 : vector<1x128xi1> to vector<1x128xi1>
      %80 = vector.broadcast %79 : vector<1x128xi1> to vector<32x128xi1>
      %81 = arith.select %80, %75, %61 : vector<32x128xi1>, vector<32x128xf32>
      %c3_i32 = arith.constant 3 : i32
      %82 = arith.index_cast %c3_i32 : i32 to index
      %c0_31 = arith.constant 0 : index
      %c0_32 = arith.constant 0 : index
      %83 = vector.load %arg3[%82, %c0_31, %c0_32] : memref<8x32x128xbf16, #tpu.memory_space<vmem>>, vector<1x32x128xbf16>
      %84 = vector.shape_cast %83 : vector<1x32x128xbf16> to vector<32x128xbf16>
      %85 = arith.extf %84 : vector<32x128xbf16> to vector<32x128xf32>
      %86 = arith.truncf %69 : vector<32x128xf32> to vector<32x128xbf16>
      %cst_33 = arith.constant dense<0.000000e+00> : vector<32x128xf32>
      %87 = tpu.matmul %11, %86, %cst_33 {dimension_numbers = #tpu.dot_dimension_numbers<[1], [0], [0], [1], [0, 0, 1, 1], [], []>} : vector<32x32xbf16>, vector<32x128xbf16>, vector<32x128xf32> -> vector<32x128xf32>
      %88 = arith.addf %85, %87 : vector<32x128xf32>
      %89 = math.tanh %88 : vector<32x128xf32>
      %90 = arith.truncf %89 : vector<32x128xf32> to vector<32x128xbf16>
      %91 = arith.truncf %75 : vector<32x128xf32> to vector<32x128xbf16>
      %92 = tpu.concatenate %90, %91 in 0 : vector<32x128xbf16>, vector<32x128xbf16> -> vector<64x128xbf16>
      %cst_34 = arith.constant dense<0.000000e+00> : vector<32x128xf32>
      %93 = tpu.matmul %12, %92, %cst_34 {dimension_numbers = #tpu.dot_dimension_numbers<[1], [0], [0], [1], [0, 0, 1, 1], [], []>} : vector<32x64xbf16>, vector<64x128xbf16>, vector<32x128xf32> -> vector<32x128xf32>
      %94 = arith.addf %93, %15 : vector<32x128xf32>
      %95 = math.tanh %94 : vector<32x128xf32>
      %96 = arith.addi %0, %c3_i32 : i32
      %97 = vector.broadcast %96 : i32 to vector<1x128xi32>
      %98 = arith.cmpi eq, %18, %97 : vector<1x128xi32>
      %99 = vector.shape_cast %98 : vector<1x128xi1> to vector<1x128xi1>
      %100 = vector.broadcast %99 : vector<1x128xi1> to vector<32x128xi1>
      %101 = arith.select %100, %95, %81 : vector<32x128xi1>, vector<32x128xf32>
      %c4_i32 = arith.constant 4 : i32
      %102 = arith.index_cast %c4_i32 : i32 to index
      %c0_35 = arith.constant 0 : index
      %c0_36 = arith.constant 0 : index
      %103 = vector.load %arg3[%102, %c0_35, %c0_36] : memref<8x32x128xbf16, #tpu.memory_space<vmem>>, vector<1x32x128xbf16>
      %104 = vector.shape_cast %103 : vector<1x32x128xbf16> to vector<32x128xbf16>
      %105 = arith.extf %104 : vector<32x128xbf16> to vector<32x128xf32>
      %106 = arith.truncf %89 : vector<32x128xf32> to vector<32x128xbf16>
      %cst_37 = arith.constant dense<0.000000e+00> : vector<32x128xf32>
      %107 = tpu.matmul %11, %106, %cst_37 {dimension_numbers = #tpu.dot_dimension_numbers<[1], [0], [0], [1], [0, 0, 1, 1], [], []>} : vector<32x32xbf16>, vector<32x128xbf16>, vector<32x128xf32> -> vector<32x128xf32>
      %108 = arith.addf %105, %107 : vector<32x128xf32>
      %109 = math.tanh %108 : vector<32x128xf32>
      %110 = arith.truncf %109 : vector<32x128xf32> to vector<32x128xbf16>
      %111 = arith.truncf %95 : vector<32x128xf32> to vector<32x128xbf16>
      %112 = tpu.concatenate %110, %111 in 0 : vector<32x128xbf16>, vector<32x128xbf16> -> vector<64x128xbf16>
      %cst_38 = arith.constant dense<0.000000e+00> : vector<32x128xf32>
      %113 = tpu.matmul %12, %112, %cst_38 {dimension_numbers = #tpu.dot_dimension_numbers<[1], [0], [0], [1], [0, 0, 1, 1], [], []>} : vector<32x64xbf16>, vector<64x128xbf16>, vector<32x128xf32> -> vector<32x128xf32>
      %114 = arith.addf %113, %15 : vector<32x128xf32>
      %115 = math.tanh %114 : vector<32x128xf32>
      %116 = arith.addi %0, %c4_i32 : i32
      %117 = vector.broadcast %116 : i32 to vector<1x128xi32>
      %118 = arith.cmpi eq, %18, %117 : vector<1x128xi32>
      %119 = vector.shape_cast %118 : vector<1x128xi1> to vector<1x128xi1>
      %120 = vector.broadcast %119 : vector<1x128xi1> to vector<32x128xi1>
      %121 = arith.select %120, %115, %101 : vector<32x128xi1>, vector<32x128xf32>
      %c5_i32 = arith.constant 5 : i32
      %122 = arith.index_cast %c5_i32 : i32 to index
      %c0_39 = arith.constant 0 : index
      %c0_40 = arith.constant 0 : index
      %123 = vector.load %arg3[%122, %c0_39, %c0_40] : memref<8x32x128xbf16, #tpu.memory_space<vmem>>, vector<1x32x128xbf16>
      %124 = vector.shape_cast %123 : vector<1x32x128xbf16> to vector<32x128xbf16>
      %125 = arith.extf %124 : vector<32x128xbf16> to vector<32x128xf32>
      %126 = arith.truncf %109 : vector<32x128xf32> to vector<32x128xbf16>
      %cst_41 = arith.constant dense<0.000000e+00> : vector<32x128xf32>
      %127 = tpu.matmul %11, %126, %cst_41 {dimension_numbers = #tpu.dot_dimension_numbers<[1], [0], [0], [1], [0, 0, 1, 1], [], []>} : vector<32x32xbf16>, vector<32x128xbf16>, vector<32x128xf32> -> vector<32x128xf32>
      %128 = arith.addf %125, %127 : vector<32x128xf32>
      %129 = math.tanh %128 : vector<32x128xf32>
      %130 = arith.truncf %129 : vector<32x128xf32> to vector<32x128xbf16>
      %131 = arith.truncf %115 : vector<32x128xf32> to vector<32x128xbf16>
      %132 = tpu.concatenate %130, %131 in 0 : vector<32x128xbf16>, vector<32x128xbf16> -> vector<64x128xbf16>
      %cst_42 = arith.constant dense<0.000000e+00> : vector<32x128xf32>
      %133 = tpu.matmul %12, %132, %cst_42 {dimension_numbers = #tpu.dot_dimension_numbers<[1], [0], [0], [1], [0, 0, 1, 1], [], []>} : vector<32x64xbf16>, vector<64x128xbf16>, vector<32x128xf32> -> vector<32x128xf32>
      %134 = arith.addf %133, %15 : vector<32x128xf32>
      %135 = math.tanh %134 : vector<32x128xf32>
      %136 = arith.addi %0, %c5_i32 : i32
      %137 = vector.broadcast %136 : i32 to vector<1x128xi32>
      %138 = arith.cmpi eq, %18, %137 : vector<1x128xi32>
      %139 = vector.shape_cast %138 : vector<1x128xi1> to vector<1x128xi1>
      %140 = vector.broadcast %139 : vector<1x128xi1> to vector<32x128xi1>
      %141 = arith.select %140, %135, %121 : vector<32x128xi1>, vector<32x128xf32>
      %c6_i32 = arith.constant 6 : i32
      %142 = arith.index_cast %c6_i32 : i32 to index
      %c0_43 = arith.constant 0 : index
      %c0_44 = arith.constant 0 : index
      %143 = vector.load %arg3[%142, %c0_43, %c0_44] : memref<8x32x128xbf16, #tpu.memory_space<vmem>>, vector<1x32x128xbf16>
      %144 = vector.shape_cast %143 : vector<1x32x128xbf16> to vector<32x128xbf16>
      %145 = arith.extf %144 : vector<32x128xbf16> to vector<32x128xf32>
      %146 = arith.truncf %129 : vector<32x128xf32> to vector<32x128xbf16>
      %cst_45 = arith.constant dense<0.000000e+00> : vector<32x128xf32>
      %147 = tpu.matmul %11, %146, %cst_45 {dimension_numbers = #tpu.dot_dimension_numbers<[1], [0], [0], [1], [0, 0, 1, 1], [], []>} : vector<32x32xbf16>, vector<32x128xbf16>, vector<32x128xf32> -> vector<32x128xf32>
      %148 = arith.addf %145, %147 : vector<32x128xf32>
      %149 = math.tanh %148 : vector<32x128xf32>
      %150 = arith.truncf %149 : vector<32x128xf32> to vector<32x128xbf16>
      %151 = arith.truncf %135 : vector<32x128xf32> to vector<32x128xbf16>
      %152 = tpu.concatenate %150, %151 in 0 : vector<32x128xbf16>, vector<32x128xbf16> -> vector<64x128xbf16>
      %cst_46 = arith.constant dense<0.000000e+00> : vector<32x128xf32>
      %153 = tpu.matmul %12, %152, %cst_46 {dimension_numbers = #tpu.dot_dimension_numbers<[1], [0], [0], [1], [0, 0, 1, 1], [], []>} : vector<32x64xbf16>, vector<64x128xbf16>, vector<32x128xf32> -> vector<32x128xf32>
      %154 = arith.addf %153, %15 : vector<32x128xf32>
      %155 = math.tanh %154 : vector<32x128xf32>
      %156 = arith.addi %0, %c6_i32 : i32
      %157 = vector.broadcast %156 : i32 to vector<1x128xi32>
      %158 = arith.cmpi eq, %18, %157 : vector<1x128xi32>
      %159 = vector.shape_cast %158 : vector<1x128xi1> to vector<1x128xi1>
      %160 = vector.broadcast %159 : vector<1x128xi1> to vector<32x128xi1>
      %161 = arith.select %160, %155, %141 : vector<32x128xi1>, vector<32x128xf32>
      %c7_i32 = arith.constant 7 : i32
      %162 = arith.index_cast %c7_i32 : i32 to index
      %c0_47 = arith.constant 0 : index
      %c0_48 = arith.constant 0 : index
      %163 = vector.load %arg3[%162, %c0_47, %c0_48] : memref<8x32x128xbf16, #tpu.memory_space<vmem>>, vector<1x32x128xbf16>
      %164 = vector.shape_cast %163 : vector<1x32x128xbf16> to vector<32x128xbf16>
      %165 = arith.extf %164 : vector<32x128xbf16> to vector<32x128xf32>
      %166 = arith.truncf %149 : vector<32x128xf32> to vector<32x128xbf16>
      %cst_49 = arith.constant dense<0.000000e+00> : vector<32x128xf32>
      %167 = tpu.matmul %11, %166, %cst_49 {dimension_numbers = #tpu.dot_dimension_numbers<[1], [0], [0], [1], [0, 0, 1, 1], [], []>} : vector<32x32xbf16>, vector<32x128xbf16>, vector<32x128xf32> -> vector<32x128xf32>
      %168 = arith.addf %165, %167 : vector<32x128xf32>
      %169 = math.tanh %168 : vector<32x128xf32>
      %170 = arith.truncf %169 : vector<32x128xf32> to vector<32x128xbf16>
      %171 = arith.truncf %155 : vector<32x128xf32> to vector<32x128xbf16>
      %172 = tpu.concatenate %170, %171 in 0 : vector<32x128xbf16>, vector<32x128xbf16> -> vector<64x128xbf16>
      %cst_50 = arith.constant dense<0.000000e+00> : vector<32x128xf32>
      %173 = tpu.matmul %12, %172, %cst_50 {dimension_numbers = #tpu.dot_dimension_numbers<[1], [0], [0], [1], [0, 0, 1, 1], [], []>} : vector<32x64xbf16>, vector<64x128xbf16>, vector<32x128xf32> -> vector<32x128xf32>
      %174 = arith.addf %173, %15 : vector<32x128xf32>
      %175 = math.tanh %174 : vector<32x128xf32>
      %176 = arith.addi %0, %c7_i32 : i32
      %177 = vector.broadcast %176 : i32 to vector<1x128xi32>
      %178 = arith.cmpi eq, %18, %177 : vector<1x128xi32>
      %179 = vector.shape_cast %178 : vector<1x128xi1> to vector<1x128xi1>
      %180 = vector.broadcast %179 : vector<1x128xi1> to vector<32x128xi1>
      %181 = arith.select %180, %175, %161 : vector<32x128xi1>, vector<32x128xf32>
      %c8_i32_51 = arith.constant 8 : i32
      %c0_52 = arith.constant 0 : index
      %c0_53 = arith.constant 0 : index
      %182 = vector.load %arg11[%c0_52, %c0_53] : memref<32x128xf32, #tpu.memory_space<vmem>>, vector<32x128xf32>
      tpu.vector_store %arg11[%c0_52, %c0_53], %169 {strides = array<i32>} : memref<32x128xf32, #tpu.memory_space<vmem>>, vector<32x128xf32>,
      %c0_54 = arith.constant 0 : index
      %c0_55 = arith.constant 0 : index
      %183 = vector.load %arg12[%c0_54, %c0_55] : memref<32x128xf32, #tpu.memory_space<vmem>>, vector<32x128xf32>
      tpu.vector_store %arg12[%c0_54, %c0_55], %175 {strides = array<i32>} : memref<32x128xf32, #tpu.memory_space<vmem>>, vector<32x128xf32>,
      %c0_56 = arith.constant 0 : index
      %c0_57 = arith.constant 0 : index
      %184 = vector.load %arg13[%c0_56, %c0_57] : memref<32x128xf32, #tpu.memory_space<vmem>>, vector<32x128xf32>
      tpu.vector_store %arg13[%c0_56, %c0_57], %181 {strides = array<i32>} : memref<32x128xf32, #tpu.memory_space<vmem>>, vector<32x128xf32>,
    } else {
    }
    %c0_i32_2 = arith.constant 0 : i32
    %8 = arith.cmpi eq, %arg1, %c0_i32_2 : i32
    %9 = arith.extui %8 : i1 to i32
    %c0_i32_3 = arith.constant 0 : i32
    %10 = arith.cmpi ne, %9, %c0_i32_3 : i32
    scf.if %10 {
      %c0_4 = arith.constant 0 : index
      %c0_5 = arith.constant 0 : index
      %11 = vector.load %arg8[%c0_4, %c0_5] : memref<128x32xf32, #tpu.memory_space<vmem>>, vector<128x32xf32>
      %c0_6 = arith.constant 0 : index
      %c0_7 = arith.constant 0 : index
      %12 = vector.load %arg13[%c0_6, %c0_7] : memref<32x128xf32, #tpu.memory_space<vmem>>, vector<32x128xf32>
      %cst = arith.constant dense<0.000000e+00> : vector<128x128xf32>
      %13 = tpu.matmul %11, %12, %cst {dimension_numbers = #tpu.dot_dimension_numbers<[1], [0], [0], [1], [0, 0, 1, 1], [], []>} : vector<128x32xf32>, vector<32x128xf32>, vector<128x128xf32> -> vector<128x128xf32>
      %c0_8 = arith.constant 0 : index
      %c0_9 = arith.constant 0 : index
      %14 = vector.load %arg9[%c0_8, %c0_9] : memref<128x1xf32, #tpu.memory_space<vmem>>, vector<128x1xf32>
      %15 = vector.broadcast %14 : vector<128x1xf32> to vector<128x128xf32>
      %16 = arith.addf %13, %15 : vector<128x128xf32>
      %c0_10 = arith.constant 0 : index
      %c0_11 = arith.constant 0 : index
      %17 = vector.load %arg10[%c0_10, %c0_11] : memref<128x128xf32, #tpu.memory_space<vmem>>, vector<128x128xf32>
      tpu.vector_store %arg10[%c0_10, %c0_11], %16 {strides = array<i32>} : memref<128x128xf32, #tpu.memory_space<vmem>>, vector<128x128xf32>,
    } else {
    }
    return
  }
  func.func @transform_0(%arg0: i32, %arg1: i32, %arg2: memref<1xi32, #tpu.memory_space<smem>>) -> (i32, i32, i32) {
    %c0_i32 = arith.constant 0 : i32
    %c0_i32_0 = arith.constant 0 : i32
    return %arg1, %c0_i32, %arg0 : i32, i32, i32
  }
  func.func @transform_1(%arg0: i32, %arg1: i32, %arg2: memref<1xi32, #tpu.memory_space<smem>>) -> (i32, i32) {
    %c0_i32 = arith.constant 0 : i32
    %c0_i32_0 = arith.constant 0 : i32
    return %c0_i32, %arg0 : i32, i32
  }
  func.func @transform_2(%arg0: i32, %arg1: i32, %arg2: memref<1xi32, #tpu.memory_space<smem>>) -> (i32, i32) {
    %c0_i32 = arith.constant 0 : i32
    %c0_i32_0 = arith.constant 0 : i32
    %c0_i32_1 = arith.constant 0 : i32
    return %c0_i32, %c0_i32_0 : i32, i32
  }
  func.func @transform_3(%arg0: i32, %arg1: i32, %arg2: memref<1xi32, #tpu.memory_space<smem>>) -> (i32, i32) {
    %c0_i32 = arith.constant 0 : i32
    %c0_i32_0 = arith.constant 0 : i32
    %c0_i32_1 = arith.constant 0 : i32
    return %c0_i32, %c0_i32_0 : i32, i32
  }
  func.func @transform_4(%arg0: i32, %arg1: i32, %arg2: memref<1xi32, #tpu.memory_space<smem>>) -> (i32, i32) {
    %c0_i32 = arith.constant 0 : i32
    %c0_i32_0 = arith.constant 0 : i32
    %c0_i32_1 = arith.constant 0 : i32
    return %c0_i32, %c0_i32_0 : i32, i32
  }
  func.func @transform_5(%arg0: i32, %arg1: i32, %arg2: memref<1xi32, #tpu.memory_space<smem>>) -> (i32, i32) {
    %c0_i32 = arith.constant 0 : i32
    %c0_i32_0 = arith.constant 0 : i32
    %c0_i32_1 = arith.constant 0 : i32
    return %c0_i32, %c0_i32_0 : i32, i32
  }
  func.func @transform_6(%arg0: i32, %arg1: i32, %arg2: memref<1xi32, #tpu.memory_space<smem>>) -> (i32, i32) {
    %c0_i32 = arith.constant 0 : i32
    %c0_i32_0 = arith.constant 0 : i32
    %c0_i32_1 = arith.constant 0 : i32
    return %c0_i32, %c0_i32_0 : i32, i32
  }
  func.func @transform_7(%arg0: i32, %arg1: i32, %arg2: memref<1xi32, #tpu.memory_space<smem>>) -> (i32, i32) {
    %c0_i32 = arith.constant 0 : i32
    %c0_i32_0 = arith.constant 0 : i32
    return %c0_i32, %arg0 : i32, i32
  }
}

</mosaic_0001>

<bundles_post_ra>
// kernel: rnn_forward.1
= control target key start
LH: loop header
LB: loop body
LE: loop exit
PB: predicated region body
PF: predicated region fallthrough
CT: control target
= control target key end

     0   :  { %v1532_v0 = vmov 0.0   ;;  %s2186_s0 = inlined_call_operand.<no memory space> [shape: s32[1], index: 0, kind: input, shape index: {}]   ;;  %s2187_s1 = inlined_call_operand.vmem [shape: bf16[8,32,128], index: 1, kind: input, shape index: {}]   ;;  %s2188_s2 = inlined_call_operand.vmem [shape: s32[1,128], index: 2, kind: input, shape index: {}]   ;;  %s2189_s3 = inlined_call_operand.vmem [shape: bf16[32,32], index: 3, kind: input, shape index: {}]   ;;  %s2190_s4 = inlined_call_operand.vmem [shape: bf16[32,64], index: 4, kind: input, shape index: {}]   ;;  %s2191_s5 = inlined_call_operand.vmem [shape: f32[32,1], index: 5, kind: input, shape index: {}]   ;;  %s2192_s6 = inlined_call_operand.vmem [shape: f32[128,32], index: 6, kind: input, shape index: {}]   ;;  %s2193_s7 = inlined_call_operand.vmem [shape: f32[128,1], index: 7, kind: input, shape index: {}]   ;;  %s2194_s8 = inlined_call_operand.vmem [shape: f32[128,128], index: 8, kind: output, shape index: {}]  }
   0x1   :  { %34 = vst [vmem:[#allocation2 + $0x10] sm:$0xff] %v1532_v0  ;;  %p1205_p0 = scmp.le.s32.totalorder %s2186_s0, 0 }
   0x2   :  { %35 = vst [vmem:[#allocation2] sm:$0xff] %v1532_v0 }
   0x3   :  { %36 = vst [vmem:[#allocation2 + $0x18] sm:$0xff] %v1532_v0 }
   0x4   :  { %37 = vst [vmem:[#allocation2 + $0x8] sm:$0xff] %v1532_v0 }
   0x5   :  { %38 = vst [vmem:[#allocation3] sm:$0xff] %v1532_v0 }
   0x6   :  { %39 = vst [vmem:[#allocation3 + $0x18] sm:$0xff] %v1532_v0 }
   0x7   :  { %40 = vst [vmem:[#allocation3 + $0x8] sm:$0xff] %v1532_v0 }
   0x8   :  { %41 = vst [vmem:[#allocation3 + $0x10] sm:$0xff] %v1532_v0  ;;  %50 = sbr.rel (%p1205_p0) target bundleno = 1658 (0x67a), region = 37 }
   0x9   :  { %42 = vst [vmem:[#allocation4] sm:$0xff] %v1532_v0 }
   0xa   :  { %43 = vst [vmem:[#allocation4 + $0x8] sm:$0xff] %v1532_v0 }
   0xb   :  { %44 = vst [vmem:[#allocation4 + $0x10] sm:$0xff] %v1532_v0 }
   0xc   :  { %45 = vst [vmem:[#allocation4 + $0x18] sm:$0xff] %v1532_v0 }
   0xd   :  { %v87_v1 = vld [vmem:[#allocation2 + $0x18] sm:$0xff]  ;;  %v88_v2 = vld [vmem:[#allocation2 + $0x8] sm:$0xff]  ;;  %v85_v3 = vld [vmem:[#allocation2 + $0x10] sm:$0xff]  ;;  %vm117_vm0 = vcmask 261120   ;;  %v1533_v30 = vmov 0   ;;  %vm193_vm1 = vcmask 523264  }
   0xe   :  { %v106_v4 = vpack.c.bf16 %v88_v2, %v87_v1  ;;  %v86_v5 = vld [vmem:[#allocation2] sm:$0xff]  ;;  %v1593_v8 = vld [vmem:[%s2189_s3 + $0x8] sm:$0xff]  ;;  %v90_v16 = vld [vmem:[#allocation3 + $0x18] sm:$0xff]  ;;  %1398 = vset.pattern.permute.xlu1 %v1533_v30  ;;  %1397 = vset.pattern.permute.xlu0 %v1533_v30 }
   0xf   :  { %v105_v6 = vpack.c.bf16 %v86_v5, %v85_v3  ;;  %v1586_v7 = vld [vmem:[%s2189_s3] sm:$0xff]  ;;  %v91_v9 = vld [vmem:[#allocation3 + $0x8] sm:$0xff]  ;;  %v92_v10 = vld [vmem:[#allocation3 + $0x10] sm:$0xff]  ;;  %v156_v19 = vpack.c.bf16 %v90_v16, %v90_v16 }
  0x10   :  { %130 = vmatpush.bf16.msra.mxu0 %v106_v4  ;;  %v157_v11 = vpack.c.bf16 %v91_v9, %v91_v9  ;;  %v158_v12 = vpack.c.bf16 %v92_v10, %v92_v10  ;;  %v89_v15 = vld [vmem:[#allocation3] sm:$0xff]  ;;  %v1367_v25 = vld [vmem:[%s2187_s1 + $0x8] sm:$0xff]   ;;  %v61_v41 = vld [vmem:[%s2191_s5 + $0x10] sm:$0xff] }
  0x11   :  { %v155_v18 = vpack.c.bf16 %v89_v15, %v89_v15  ;;  %v176_v22 = vunpack.c.l.b16 %v156_v19  ;;  %v1304_v26 = vld [vmem:[%s2187_s1] sm:$0xff]   ;;  %v1309_v27 = vunpack.c.l.bf16 %v1367_v25  ;;  %v1310_v35 = vunpack.c.h.bf16 %v1367_v25  ;;  %v60_v42 = vld [vmem:[%s2191_s5 + $0x8] sm:$0xff]  ;;  %75 = vperm.xlu0 %1397, %v61_v41   ;;  %v62_v53 = vld [vmem:[%s2191_s5 + $0x18] sm:$0xff] }
  0x12   :  { %v177_v13 = vunpack.c.l.b16 %v157_v11  ;;  %v178_v14 = vunpack.c.l.b16 %v158_v12  ;;  %v59_v28 = vld [vmem:[%s2191_s5] sm:$0xff]  ;;  %v1306_v31 = vunpack.c.h.bf16 %v1304_v26  ;;  %v1305_v32 = vunpack.c.l.bf16 %v1304_v26  ;;  %v1629_v57 = vld [vmem:[%s2190_s4 + $0x8] sm:$0xff]  ;;  %v1369_v2 = vld [vmem:[%s2187_s1 + $0x18] sm:$0xff]  }
  0x13   :  { %v175_v21 = vunpack.c.l.b16 %v155_v18  ;;  %65 = vperm.xlu1 %1398, %v59_v28   ;;  %v1620_v56 = vld [vmem:[%s2190_s4] sm:$0xff]  ;;  %v1368_v4 = vld [vmem:[%s2187_s1 + $0x10] sm:$0xff]   ;;  %v1318_v18 = vunpack.c.h.bf16 %v1369_v2 }
  0x14   :  { %131 = vmatpush.bf16.msra.mxu0 %v105_v6  ;;  %v180_v17 = vpack.c.b16 %v178_v14, %v177_v13  ;;  %v1317_v6 = vunpack.c.l.bf16 %v1369_v2  ;;  %v1314_v11 = vunpack.c.h.bf16 %v1368_v4  ;;  %v1313_v12 = vunpack.c.l.bf16 %v1368_v4  ;;  %v1371_v2 = vld [vmem:[%s2187_s1 + $0x28] sm:$0xff]  }
  0x15   :  { %v179_v23 = vpack.c.b16 %v176_v22, %v175_v21 }
  0x16   :  { %204 = vmatpush.bf16.msra.mxu1 %v180_v17 }
  0x17   :  { %1215 = vmatmul.msk.bf16.vlgmr.msra.gmra.mxu0 %vm117_vm0, %v1586_v7 }
  0x19   :  { %80 = vperm.xlu0 %1397, %v62_v53  }
  0x1a   :  { %205 = vmatpush.bf16.msra.mxu1 %v179_v23 }
  0x1b   :  { %70 = vperm.xlu1 %1398, %v60_v42  }
  0x27   :  { %1216 = vmatmul.msk.bf16.gmra.mxu0 %vm117_vm0, %v1593_v8 }
  0x83   :  { %v1637_v62 = vpop.permute.xlu0 %75 }
  0x85   :  { %v1635_v60 = vpop.permute.xlu1 %65 }
  0x8b   :  { %v1650_v13 = vpop.permute.xlu0 %80 }
  0x8d   :  { %v1639_v1 = vpop.permute.xlu1 %70 }
  0x94   :  { %v133_v20 = vpop.f32.mrf.mxu0 }
  0x95   :  { %v143_v36 = vadd.f32 %v1305_v32, %v133_v20 }
  0x9c   :  { %v135_v24 = vpop.f32.mrf.mxu0 }
  0x9d   :  { %v144_v34 = vadd.f32 %v1306_v31, %v135_v24 }
  0xa4   :  { %v138_v29 = vpop.f32.mrf.mxu0 }
  0xa5   :  { %v145_v33 = vadd.f32 %v1309_v27, %v138_v29 }
  0xa7   :  { %1399 = vtanh.f32 %v145_v33 }
  0xa8   :  { %1401 = vtanh.f32 %v144_v34 }
  0xa9   :  { %1403 = vtanh.f32 %v143_v36 }
  0xac   :  { %v140_v37 = vpop.f32.mrf.mxu0 }
  0xad   :  { %v146_v38 = vadd.f32 %v1310_v35, %v140_v37  ;;  %v1400_v39 = vpop.eup %1399 }
  0xae   :  { %v1402_v40 = vpop.eup %1401  ;;  %v153_v44 = vpack.c.bf16 %v1400_v39, %v1400_v39 }
  0xaf   :  { %1405 = vtanh.f32 %v146_v38  ;;  %v1404_v43 = vpop.eup %1403  ;;  %v152_v46 = vpack.c.bf16 %v1402_v40, %v1402_v40 }
  0xb0   :  { %v151_v48 = vpack.c.bf16 %v1404_v43, %v1404_v43  ;;  %v165_v49 = vunpack.c.l.b16 %v153_v44 }
  0xb1   :  { %v164_v51 = vunpack.c.l.b16 %v152_v46 }
  0xb2   :  { %v163_v54 = vunpack.c.l.b16 %v151_v48 }
  0xb4   :  { %v167_v55 = vpack.c.b16 %v164_v51, %v163_v54  ;;  %v83_v51 = vld [vmem:[%s2188_s2] sm:$0x1] }
  0xb5   :  { %v1406_v45 = vpop.eup %1405 }
  0xb6   :  { %v154_v47 = vpack.c.bf16 %v1406_v45, %v1406_v45 }
  0xb8   :  { %v166_v50 = vunpack.c.l.b16 %v154_v47 }
  0xba   :  { %v168_v52 = vpack.c.b16 %v166_v50, %v165_v49 }
  0xbc   :  { %206 = vmatpush.bf16.msra.mxu1 %v168_v52  ;;  %247 = vmatpush.bf16.msra.mxu2 %v168_v52  ;;  %v1680_v52 = vadd.s32 4294967295, %v83_v51 }
  0xbe   :  { %vm224_vm2 = vcmp.eq.s32.totalorder %v1680_v52, 0  ;;  %vm325_vm3 = vcmp.eq.s32.totalorder %v1680_v52, 1  ;;  %vm426_vm6 = vcmp.eq.s32.totalorder %v1680_v52, 2  ;;  %vm527_vm8 = vcmp.eq.s32.totalorder %v1680_v52, 3 }
  0xbf   :  { %v225_v54 = vsel %vm224_vm2, 1, %v1533_v30  ;;  %vm628_vm10 = vcmp.eq.s32.totalorder %v1680_v52, 4  ;;  %vm729_vm12 = vcmp.eq.s32.totalorder %v1680_v52, 5  ;;  %vm830_vm14 = vcmp.eq.s32.totalorder %v1680_v52, 6 }
  0xc0   :  { %207 = vmatpush.bf16.msra.mxu1 %v167_v55  ;;  %248 = vmatpush.bf16.msra.mxu2 %v167_v55 }
  0xc3   :  { %1225 = vmatmul.msk.bf16.vlgmr.msra.gmra.mxu1 %vm193_vm1, %v1620_v56  ;;  %1231 = vmatmul.msk.bf16.vlgmr.msra.gmra.mxu2 %vm117_vm0, %v1586_v7 }
  0xd3   :  { %1226 = vmatmul.msk.bf16.gmra.mxu1 %vm193_vm1, %v1629_v57  ;;  %1232 = vmatmul.msk.bf16.gmra.mxu2 %vm117_vm0, %v1593_v8 }
 0x140   :  { %v209_v58 = vpop.f32.mrf.mxu1 }
 0x141   :  { %v210_v9 = vadd.f32 %v209_v58, %v1635_v60  ;;  %v326_v58 = vsel %vm325_vm3, 1, %v1533_v30 }
 0x146   :  { %v250_v59 = vpop.f32.mrf.mxu2 }
 0x147   :  { %v260_v19 = vadd.f32 %v1313_v12, %v250_v59 }
 0x148   :  { %v211_v61 = vpop.f32.mrf.mxu1 }
 0x149   :  { %v212_v5 = vadd.f32 %v211_v61, %v1639_v1 }
 0x14e   :  { %v252_v63 = vpop.f32.mrf.mxu2 }
 0x14f   :  { %v261_v17 = vadd.f32 %v1314_v11, %v252_v63  ;;  %v226_v63 = vperm.slane %v225_v54, 0 }
 0x150   :  { %v214_v0 = vpop.f32.mrf.mxu1 }
 0x151   :  { %v215_v3 = vadd.f32 %v214_v0, %v1637_v62  ;;  %v327_v0 = vperm.slane %v326_v58, 0  ;;  %vm1690_vm4 = vcmp.eq.s32.totalorder %v226_v63, 1 }
 0x153   :  { %1407 = vtanh.f32 %v215_v3  ;;  %v93_v3 = vld [vmem:[#allocation4] sm:$0xff]  ;;  %vm1697_vm5 = vcmp.eq.s32.totalorder %v327_v0, 1 }
 0x154   :  { %1409 = vtanh.f32 %v212_v5  ;;  %v1370_v5 = vld [vmem:[%s2187_s1 + $0x20] sm:$0xff]  }
 0x155   :  { %1411 = vtanh.f32 %v210_v9 }
 0x156   :  { %v255_v10 = vpop.f32.mrf.mxu2 }
 0x157   :  { %v262_v15 = vadd.f32 %v1317_v6, %v255_v10  ;;  %v1325_v6 = vunpack.c.l.bf16 %v1371_v2 }
 0x158   :  { %v216_v14 = vpop.f32.mrf.mxu1 }
 0x159   :  { %v217_v16 = vadd.f32 %v216_v14, %v1650_v13  ;;  %v1653_v20 = vpop.eup %1407 }
 0x15a   :  { %v1655_v22 = vpop.eup %1409  ;;  %v274_v25 = vpack.c.bf16 %v1653_v20, %v1653_v20 }
 0x15b   :  { %1413 = vtanh.f32 %v217_v16  ;;  %v1657_v24 = vpop.eup %1411  ;;  %v273_v28 = vpack.c.bf16 %v1655_v22, %v1655_v22 }
 0x15c   :  { %1415 = vtanh.f32 %v262_v15  ;;  %v294_v31 = vunpack.c.l.b16 %v274_v25  ;;  %v272_v33 = vpack.c.bf16 %v1657_v24, %v1657_v24  ;;  %v228_v14 = vsel %vm1690_vm4, %v1657_v24, %v93_v3  ;;  %v94_v25 = vld [vmem:[#allocation4 + $0x8] sm:$0xff] }
 0x15d   :  { %1417 = vtanh.f32 %v261_v17  ;;  %v293_v38 = vunpack.c.l.b16 %v273_v28  ;;  %v1321_v15 = vunpack.c.l.bf16 %v1370_v5  ;;  %v229_v24 = vsel %vm1690_vm4, %v1655_v22, %v94_v25 }
 0x15e   :  { %v257_v21 = vpop.f32.mrf.mxu2  ;;  %1419 = vtanh.f32 %v260_v19  ;;  %v292_v42 = vunpack.c.l.b16 %v272_v33 }
 0x15f   :  { %v263_v23 = vadd.f32 %v1318_v18, %v257_v21  ;;  %v1322_v18 = vunpack.c.h.bf16 %v1370_v5 }
 0x160   :  { %v296_v46 = vpack.c.b16 %v293_v38, %v292_v42 }
 0x161   :  { %v1661_v26 = vpop.eup %1413  ;;  %1421 = vtanh.f32 %v263_v23  ;;  %v1326_v23 = vunpack.c.h.bf16 %v1371_v2 }
 0x162   :  { %v275_v27 = vpack.c.bf16 %v1661_v26, %v1661_v26  ;;  %v1416_v29 = vpop.eup %1415 }
 0x163   :  { %v1418_v34 = vpop.eup %1417  ;;  %v270_v36 = vpack.c.bf16 %v1416_v29, %v1416_v29 }
 0x164   :  { %v295_v32 = vunpack.c.l.b16 %v275_v27  ;;  %v1420_v35 = vpop.eup %1419  ;;  %v269_v40 = vpack.c.bf16 %v1418_v34, %v1418_v34 }
 0x165   :  { %v268_v43 = vpack.c.bf16 %v1420_v35, %v1420_v35  ;;  %v282_v44 = vunpack.c.l.b16 %v270_v36  ;;  %v95_v36 = vld [vmem:[#allocation4 + $0x10] sm:$0xff] }
 0x166   :  { %v297_v37 = vpack.c.b16 %v295_v32, %v294_v31  ;;  %v281_v47 = vunpack.c.l.b16 %v269_v40  ;;  %v230_v22 = vsel %vm1690_vm4, %v1653_v20, %v95_v36 }
 0x167   :  { %v1422_v39 = vpop.eup %1421  ;;  %v280_v49 = vunpack.c.l.b16 %v268_v43 }
 0x168   :  { %v271_v41 = vpack.c.bf16 %v1422_v39, %v1422_v39  ;;  %304 = vmatpush.bf16.msra.mxu3 %v297_v37 }
 0x169   :  { %v284_v50 = vpack.c.b16 %v281_v47, %v280_v49 }
 0x16a   :  { %v283_v45 = vunpack.c.l.b16 %v271_v41 }
 0x16c   :  { %305 = vmatpush.bf16.msra.mxu3 %v296_v46  ;;  %v285_v48 = vpack.c.b16 %v283_v45, %v282_v44 }
 0x16e   :  { %348 = vmatpush.bf16.msrb.mxu0 %v285_v48 }
 0x170   :  { %306 = vmatpush.bf16.msra.mxu3 %v285_v48 }
 0x172   :  { %349 = vmatpush.bf16.msrb.mxu0 %v284_v50 }
 0x174   :  { %307 = vmatpush.bf16.msra.mxu3 %v284_v50  ;;  %v96_v50 = vld [vmem:[#allocation4 + $0x18] sm:$0xff] }
 0x175   :  { %1239 = vmatmul.msk.bf16.vlgmr.msrb.gmra.mxu0 %vm117_vm0, %v1586_v7  ;;  %v231_v20 = vsel %vm1690_vm4, %v1661_v26, %v96_v50 }
 0x177   :  { %1233 = vmatmul.msk.bf16.vlgmr.msra.gmra.mxu3 %vm193_vm1, %v1620_v56 }
 0x185   :  { %1240 = vmatmul.msk.bf16.gmra.mxu0 %vm117_vm0, %v1593_v8 }
 0x187   :  { %1234 = vmatmul.msk.bf16.gmra.mxu3 %vm193_vm1, %v1629_v57 }
 0x1f2   :  { %v351_v53 = vpop.f32.mrf.mxu0 }
 0x1f3   :  { %v361_v21 = vadd.f32 %v1321_v15, %v351_v53 }
 0x1fa   :  { %v309_v55 = vpop.f32.mrf.mxu3  ;;  %v353_v59 = vpop.f32.mrf.mxu0 }
 0x1fb   :  { %v310_v61 = vadd.f32 %v309_v55, %v1635_v60  ;;  %v362_v27 = vadd.f32 %v1322_v18, %v353_v59 }
 0x1fd   :  { %1423 = vtanh.f32 %v310_v61 }
 0x202   :  { %v311_v10 = vpop.f32.mrf.mxu3  ;;  %v356_v11 = vpop.f32.mrf.mxu0 }
 0x203   :  { %v1424_v12 = vpop.eup %1423  ;;  %v312_v16 = vadd.f32 %v311_v10, %v1639_v1  ;;  %v363_v19 = vadd.f32 %v1325_v6, %v356_v11 }
 0x204   :  { %v1707_v17 = vsel %vm1697_vm5, %v1424_v12, %v228_v14  ;;  %v373_v5 = vpack.c.bf16 %v1424_v12, %v1424_v12  ;;  %v1373_v12 = vld [vmem:[%s2187_s1 + $0x38] sm:$0xff]   ;;  %v1372_v14 = vld [vmem:[%s2187_s1 + $0x30] sm:$0xff]  }
 0x205   :  { %1425 = vtanh.f32 %v312_v16  ;;  %v1333_v15 = vunpack.c.l.bf16 %v1373_v12  ;;  %v1329_v16 = vunpack.c.l.bf16 %v1372_v14  ;;  %v1330_v18 = vunpack.c.h.bf16 %v1372_v14 }
 0x206   :  { %1427 = vtanh.f32 %v363_v19  ;;  %v393_v4 = vunpack.c.l.b16 %v373_v5 }
 0x207   :  { %1429 = vtanh.f32 %v361_v21 }
 0x208   :  { %1431 = vtanh.f32 %v362_v27 }
 0x20a   :  { %v314_v28 = vpop.f32.mrf.mxu3  ;;  %v358_v29 = vpop.f32.mrf.mxu0 }
 0x20b   :  { %v1426_v31 = vpop.eup %1425  ;;  %v315_v32 = vadd.f32 %v314_v28, %v1637_v62  ;;  %v364_v33 = vadd.f32 %v1326_v23, %v358_v29  ;;  %v427_v28 = vsel %vm426_vm6, 1, %v1533_v30  ;;  %v1334_v29 = vunpack.c.h.bf16 %v1373_v12 }
 0x20c   :  { %v1715_v34 = vsel %vm1697_vm5, %v1426_v31, %v229_v24  ;;  %v1428_v35 = vpop.eup %1427  ;;  %v374_v63 = vpack.c.bf16 %v1426_v31, %v1426_v31  ;;  %v428_v24 = vperm.slane %v427_v28, 0 }
 0x20d   :  { %1433 = vtanh.f32 %v315_v32  ;;  %v1430_v37 = vpop.eup %1429  ;;  %v371_v38 = vpack.c.bf16 %v1428_v35, %v1428_v35 }
 0x20e   :  { %1435 = vtanh.f32 %v364_v33  ;;  %v1432_v39 = vpop.eup %1431  ;;  %v369_v44 = vpack.c.bf16 %v1430_v37, %v1430_v37  ;;  %v394_v10 = vunpack.c.l.b16 %v374_v63  ;;  %vm1749_vm7 = vcmp.eq.s32.totalorder %v428_v24, 1 }
 0x20f   :  { %v370_v46 = vpack.c.bf16 %v1432_v39, %v1432_v39  ;;  %v383_v47 = vunpack.c.l.b16 %v371_v38 }
 0x210   :  { %v381_v51 = vunpack.c.l.b16 %v369_v44  ;;  %v397_v26 = vpack.c.b16 %v394_v10, %v393_v4 }
 0x211   :  { %v382_v53 = vunpack.c.l.b16 %v370_v46 }
 0x212   :  { %v316_v40 = vpop.f32.mrf.mxu3 }
 0x213   :  { %v1434_v41 = vpop.eup %1433  ;;  %v317_v42 = vadd.f32 %v316_v40, %v1650_v13  ;;  %v385_v0 = vpack.c.b16 %v382_v53, %v381_v51 }
 0x214   :  { %v1436_v43 = vpop.eup %1435  ;;  %v1723_v45 = vsel %vm1697_vm5, %v1434_v41, %v230_v22  ;;  %v375_v55 = vpack.c.bf16 %v1434_v41, %v1434_v41 }
 0x215   :  { %v372_v48 = vpack.c.bf16 %v1436_v43, %v1436_v43  ;;  %1437 = vtanh.f32 %v317_v42 }
 0x216   :  { %v395_v2 = vunpack.c.l.b16 %v375_v55 }
 0x217   :  { %v384_v49 = vunpack.c.l.b16 %v372_v48 }
 0x219   :  { %v386_v54 = vpack.c.b16 %v384_v49, %v383_v47 }
 0x21b   :  { %v1438_v58 = vpop.eup %1437  ;;  %449 = vmatpush.bf16.msrb.mxu1 %v386_v54 }
 0x21c   :  { %v1730_v59 = vsel %vm1697_vm5, %v1438_v58, %v231_v20  ;;  %v376_v61 = vpack.c.bf16 %v1438_v58, %v1438_v58 }
 0x21e   :  { %v396_v3 = vunpack.c.l.b16 %v376_v61 }
 0x21f   :  { %450 = vmatpush.bf16.msrb.mxu1 %v385_v0 }
 0x220   :  { %v398_v6 = vpack.c.b16 %v396_v3, %v395_v2 }
 0x222   :  { %405 = vmatpush.bf16.msrb.mxu2 %v398_v6  ;;  %1247 = vmatmul.msk.bf16.vlgmr.msrb.gmra.mxu1 %vm117_vm0, %v1586_v7 }
 0x226   :  { %406 = vmatpush.bf16.msrb.mxu2 %v397_v26 }
 0x22a   :  { %407 = vmatpush.bf16.msrb.mxu2 %v386_v54 }
 0x22e   :  { %408 = vmatpush.bf16.msrb.mxu2 %v385_v0 }
 0x231   :  { %1241 = vmatmul.msk.bf16.vlgmr.msrb.gmra.mxu2 %vm193_vm1, %v1620_v56 }
 0x232   :  { %1248 = vmatmul.msk.bf16.gmra.mxu1 %vm117_vm0, %v1593_v8 }
 0x241   :  { %1242 = vmatmul.msk.bf16.gmra.mxu2 %vm193_vm1, %v1629_v57 }
 0x29f   :  { %v452_v9 = vpop.f32.mrf.mxu1 }
 0x2a0   :  { %v462_v23 = vadd.f32 %v1329_v16, %v452_v9 }
 0x2a7   :  { %v454_v11 = vpop.f32.mrf.mxu1 }
 0x2a8   :  { %v463_v25 = vadd.f32 %v1330_v18, %v454_v11 }
 0x2af   :  { %v457_v19 = vpop.f32.mrf.mxu1 }
 0x2b0   :  { %v464_v21 = vadd.f32 %v1333_v15, %v457_v19 }
 0x2b2   :  { %1439 = vtanh.f32 %v464_v21 }
 0x2b3   :  { %1441 = vtanh.f32 %v462_v23  ;;  %v1375_v23 = vld [vmem:[%s2187_s1 + $0x48] sm:$0xff]  }
 0x2b4   :  { %v410_v27 = vpop.f32.mrf.mxu2  ;;  %1443 = vtanh.f32 %v463_v25  ;;  %v1374_v25 = vld [vmem:[%s2187_s1 + $0x40] sm:$0xff]  }
 0x2b5   :  { %v411_v31 = vadd.f32 %v410_v27, %v1635_v60  ;;  %v1341_v27 = vunpack.c.l.bf16 %v1375_v23  ;;  %v1337_v28 = vunpack.c.l.bf16 %v1374_v25 }
 0x2b7   :  { %1445 = vtanh.f32 %v411_v31  ;;  %v459_v32 = vpop.f32.mrf.mxu1 }
 0x2b8   :  { %v465_v33 = vadd.f32 %v1334_v29, %v459_v32  ;;  %v1440_v35 = vpop.eup %1439  ;;  %v1338_v29 = vunpack.c.h.bf16 %v1374_v25 }
 0x2b9   :  { %v1442_v36 = vpop.eup %1441  ;;  %v472_v41 = vpack.c.bf16 %v1440_v35, %v1440_v35  ;;  %v1342_v35 = vunpack.c.h.bf16 %v1375_v23 }
 0x2ba   :  { %1447 = vtanh.f32 %v465_v33  ;;  %v1444_v38 = vpop.eup %1443  ;;  %v470_v43 = vpack.c.bf16 %v1442_v36, %v1442_v36 }
 0x2bb   :  { %v471_v44 = vpack.c.bf16 %v1444_v38, %v1444_v38  ;;  %v484_v47 = vunpack.c.l.b16 %v472_v41 }
 0x2bc   :  { %v412_v39 = vpop.f32.mrf.mxu2  ;;  %v482_v49 = vunpack.c.l.b16 %v470_v43 }
 0x2bd   :  { %v1753_v40 = vpop.eup %1445  ;;  %v413_v22 = vadd.f32 %v412_v39, %v1639_v1  ;;  %v483_v50 = vunpack.c.l.b16 %v471_v44 }
 0x2be   :  { %v430_v42 = vsel %vm1749_vm7, %v1753_v40, %v1707_v17  ;;  %v474_v12 = vpack.c.bf16 %v1753_v40, %v1753_v40 }
 0x2bf   :  { %1449 = vtanh.f32 %v413_v22  ;;  %v486_v61 = vpack.c.b16 %v483_v50, %v482_v49 }
 0x2c0   :  { %v1448_v46 = vpop.eup %1447  ;;  %v494_v16 = vunpack.c.l.b16 %v474_v12 }
 0x2c1   :  { %v473_v48 = vpack.c.bf16 %v1448_v46, %v1448_v46 }
 0x2c3   :  { %v485_v51 = vunpack.c.l.b16 %v473_v48 }
 0x2c4   :  { %v415_v53 = vpop.f32.mrf.mxu2 }
 0x2c5   :  { %v1760_v54 = vpop.eup %1449  ;;  %v487_v55 = vpack.c.b16 %v485_v51, %v484_v47  ;;  %v416_v58 = vadd.f32 %v415_v53, %v1637_v62  ;;  %v528_v51 = vsel %vm527_vm8, 1, %v1533_v30 }
 0x2c6   :  { %v431_v20 = vsel %vm1749_vm7, %v1760_v54, %v1715_v34  ;;  %v475_v26 = vpack.c.bf16 %v1760_v54, %v1760_v54 }
 0x2c7   :  { %1451 = vtanh.f32 %v416_v58  ;;  %550 = vmatpush.bf16.msra.mxu0 %v487_v55 }
 0x2c8   :  { %v495_v15 = vunpack.c.l.b16 %v475_v26 }
 0x2ca   :  { %v498_v18 = vpack.c.b16 %v495_v15, %v494_v16 }
 0x2cb   :  { %551 = vmatpush.bf16.msra.mxu0 %v486_v61 }
 0x2cc   :  { %v417_v63 = vpop.f32.mrf.mxu2 }
 0x2cd   :  { %v1767_v0 = vpop.eup %1451  ;;  %v418_v2 = vadd.f32 %v417_v63, %v1650_v13  ;;  %v529_v63 = vperm.slane %v528_v51, 0 }
 0x2ce   :  { %v432_v3 = vsel %vm1749_vm7, %v1767_v0, %v1723_v45  ;;  %1255 = vmatmul.msk.bf16.vlgmr.msra.gmra.mxu0 %vm117_vm0, %v1586_v7  ;;  %v476_v5 = vpack.c.bf16 %v1767_v0, %v1767_v0 }
 0x2cf   :  { %1453 = vtanh.f32 %v418_v2  ;;  %vm1805_vm9 = vcmp.eq.s32.totalorder %v529_v63, 1 }
 0x2d0   :  { %v496_v9 = vunpack.c.l.b16 %v476_v5 }
 0x2d5   :  { %v1778_v6 = vpop.eup %1453 }
 0x2d6   :  { %v433_v10 = vsel %vm1749_vm7, %v1778_v6, %v1730_v59  ;;  %v477_v4 = vpack.c.bf16 %v1778_v6, %v1778_v6  ;;  %v1377_v6 = vld [vmem:[%s2187_s1 + $0x58] sm:$0xff]  }
 0x2d8   :  { %v497_v11 = vunpack.c.l.b16 %v477_v4  ;;  %v629_v4 = vsel %vm628_vm10, 1, %v1533_v30 }
 0x2da   :  { %v499_v14 = vpack.c.b16 %v497_v11, %v496_v9 }
 0x2dc   :  { %506 = vmatpush.bf16.msrb.mxu3 %v499_v14 }
 0x2de   :  { %1256 = vmatmul.msk.bf16.gmra.mxu0 %vm117_vm0, %v1593_v8 }
 0x2e0   :  { %507 = vmatpush.bf16.msrb.mxu3 %v498_v18 }
 0x2e4   :  { %508 = vmatpush.bf16.msrb.mxu3 %v487_v55 }
 0x2e8   :  { %509 = vmatpush.bf16.msrb.mxu3 %v486_v61 }
 0x2eb   :  { %1249 = vmatmul.msk.bf16.vlgmr.msrb.gmra.mxu3 %vm193_vm1, %v1620_v56 }
 0x2fb   :  { %1250 = vmatmul.msk.bf16.gmra.mxu3 %vm193_vm1, %v1629_v57 }
 0x34b   :  { %v553_v19 = vpop.f32.mrf.mxu0 }
 0x34c   :  { %v563_v32 = vadd.f32 %v1337_v28, %v553_v19 }
 0x353   :  { %v555_v21 = vpop.f32.mrf.mxu0 }
 0x354   :  { %v564_v33 = vadd.f32 %v1338_v29, %v555_v21 }
 0x35b   :  { %v558_v31 = vpop.f32.mrf.mxu0 }
 0x35c   :  { %v565_v24 = vadd.f32 %v1341_v27, %v558_v31  ;;  %v1349_v31 = vunpack.c.l.bf16 %v1377_v6 }
 0x35e   :  { %1455 = vtanh.f32 %v565_v24 }
 0x35f   :  { %1457 = vtanh.f32 %v563_v32 }
 0x360   :  { %1459 = vtanh.f32 %v564_v33 }
 0x363   :  { %v560_v36 = vpop.f32.mrf.mxu0 }
 0x364   :  { %v566_v38 = vadd.f32 %v1342_v35, %v560_v36  ;;  %v1456_v39 = vpop.eup %1455 }
 0x365   :  { %v1458_v41 = vpop.eup %1457  ;;  %v573_v43 = vpack.c.bf16 %v1456_v39, %v1456_v39  ;;  %v1350_v39 = vunpack.c.h.bf16 %v1377_v6 }
 0x366   :  { %1461 = vtanh.f32 %v566_v38  ;;  %v1460_v22 = vpop.eup %1459  ;;  %v571_v44 = vpack.c.bf16 %v1458_v41, %v1458_v41 }
 0x367   :  { %v572_v46 = vpack.c.bf16 %v1460_v22, %v1460_v22  ;;  %v585_v48 = vunpack.c.l.b16 %v573_v43 }
 0x368   :  { %v583_v53 = vunpack.c.l.b16 %v571_v44 }
 0x369   :  { %v584_v55 = vunpack.c.l.b16 %v572_v46 }
 0x36b   :  { %v587_v5 = vpack.c.b16 %v584_v55, %v583_v53 }
 0x36c   :  { %v1462_v47 = vpop.eup %1461 }
 0x36d   :  { %v574_v49 = vpack.c.bf16 %v1462_v47, %v1462_v47 }
 0x36e   :  { %v511_v50 = vpop.f32.mrf.mxu3 }
 0x36f   :  { %v512_v58 = vadd.f32 %v511_v50, %v1635_v60  ;;  %v586_v61 = vunpack.c.l.b16 %v574_v49 }
 0x371   :  { %1463 = vtanh.f32 %v512_v58  ;;  %v588_v2 = vpack.c.b16 %v586_v61, %v585_v48 }
 0x373   :  { %651 = vmatpush.bf16.msra.mxu1 %v588_v2 }
 0x376   :  { %v513_v26 = vpop.f32.mrf.mxu3 }
 0x377   :  { %v1464_v9 = vpop.eup %1463  ;;  %v514_v11 = vadd.f32 %v513_v26, %v1639_v1  ;;  %652 = vmatpush.bf16.msra.mxu1 %v587_v5 }
 0x378   :  { %v1817_v12 = vsel %vm1805_vm9, %v1464_v9, %v430_v42  ;;  %v575_v23 = vpack.c.bf16 %v1464_v9, %v1464_v9  ;;  %v630_v9 = vperm.slane %v629_v4, 0 }
 0x379   :  { %1465 = vtanh.f32 %v514_v11  ;;  %v1380_v11 = vld [vmem:[%s2187_s1 + $0x70] sm:$0xff]  }
 0x37a   :  { %1263 = vmatmul.msk.bf16.vlgmr.msra.gmra.mxu1 %vm117_vm0, %v1586_v7  ;;  %v595_v28 = vunpack.c.l.b16 %v575_v23  ;;  %vm1867_vm11 = vcmp.eq.s32.totalorder %v630_v9, 1 }
 0x37e   :  { %v516_v14 = vpop.f32.mrf.mxu3 }
 0x37f   :  { %v1466_v15 = vpop.eup %1465  ;;  %v517_v16 = vadd.f32 %v516_v14, %v1637_v62 }
 0x380   :  { %v1829_v17 = vsel %vm1805_vm9, %v1466_v15, %v431_v20  ;;  %v576_v0 = vpack.c.bf16 %v1466_v15, %v1466_v15 }
 0x381   :  { %1467 = vtanh.f32 %v517_v16 }
 0x382   :  { %v596_v27 = vunpack.c.l.b16 %v576_v0 }
 0x384   :  { %v599_v29 = vpack.c.b16 %v596_v27, %v595_v28 }
 0x386   :  { %v518_v40 = vpop.f32.mrf.mxu3 }
 0x387   :  { %v1468_v42 = vpop.eup %1467  ;;  %v519_v18 = vadd.f32 %v518_v40, %v1650_v13 }
 0x388   :  { %v1839_v19 = vsel %vm1805_vm9, %v1468_v42, %v432_v3  ;;  %v577_v34 = vpack.c.bf16 %v1468_v42, %v1468_v42 }
 0x389   :  { %1469 = vtanh.f32 %v519_v18 }
 0x38a   :  { %1264 = vmatmul.msk.bf16.gmra.mxu1 %vm117_vm0, %v1593_v8  ;;  %v597_v21 = vunpack.c.l.b16 %v577_v34 }
 0x38f   :  { %v1470_v54 = vpop.eup %1469 }
 0x390   :  { %v1850_v20 = vsel %vm1805_vm9, %v1470_v54, %v433_v10  ;;  %v578_v45 = vpack.c.bf16 %v1470_v54, %v1470_v54  ;;  %v1376_v10 = vld [vmem:[%s2187_s1 + $0x50] sm:$0xff]  }
 0x391   :  { %v1345_v24 = vunpack.c.l.bf16 %v1376_v10  ;;  %v1346_v32 = vunpack.c.h.bf16 %v1376_v10 }
 0x392   :  { %v598_v3 = vunpack.c.l.b16 %v578_v45 }
 0x394   :  { %v600_v25 = vpack.c.b16 %v598_v3, %v597_v21 }
 0x396   :  { %607 = vmatpush.bf16.msra.mxu2 %v600_v25 }
 0x39a   :  { %608 = vmatpush.bf16.msra.mxu2 %v599_v29 }
 0x39e   :  { %609 = vmatpush.bf16.msra.mxu2 %v588_v2 }
 0x3a2   :  { %610 = vmatpush.bf16.msra.mxu2 %v587_v5 }
 0x3a5   :  { %1257 = vmatmul.msk.bf16.vlgmr.msra.gmra.mxu2 %vm193_vm1, %v1620_v56 }
 0x3b5   :  { %1258 = vmatmul.msk.bf16.gmra.mxu2 %vm193_vm1, %v1629_v57 }
 0x3f7   :  { %v654_v59 = vpop.f32.mrf.mxu1 }
 0x3f8   :  { %v664_v36 = vadd.f32 %v1345_v24, %v654_v59 }
 0x3ff   :  { %v656_v37 = vpop.f32.mrf.mxu1 }
 0x400   :  { %v665_v38 = vadd.f32 %v1346_v32, %v656_v37 }
 0x407   :  { %v659_v33 = vpop.f32.mrf.mxu1 }
 0x408   :  { %v666_v35 = vadd.f32 %v1349_v31, %v659_v33 }
 0x40a   :  { %1471 = vtanh.f32 %v666_v35 }
 0x40b   :  { %1473 = vtanh.f32 %v664_v36  ;;  %v1379_v36 = vld [vmem:[%s2187_s1 + $0x68] sm:$0xff]  }
 0x40c   :  { %1475 = vtanh.f32 %v665_v38  ;;  %v1378_v38 = vld [vmem:[%s2187_s1 + $0x60] sm:$0xff]  }
 0x40f   :  { %v661_v41 = vpop.f32.mrf.mxu1 }
 0x410   :  { %v667_v22 = vadd.f32 %v1350_v39, %v661_v41  ;;  %v1472_v43 = vpop.eup %1471  ;;  %v1357_v39 = vunpack.c.l.bf16 %v1379_v36 }
 0x411   :  { %v1474_v44 = vpop.eup %1473  ;;  %v674_v47 = vpack.c.bf16 %v1472_v43, %v1472_v43  ;;  %v1354_v43 = vunpack.c.h.bf16 %v1378_v38 }
 0x412   :  { %1477 = vtanh.f32 %v667_v22  ;;  %v1476_v46 = vpop.eup %1475  ;;  %v672_v48 = vpack.c.bf16 %v1474_v44, %v1474_v44  ;;  %v1353_v22 = vunpack.c.l.bf16 %v1378_v38 }
 0x413   :  { %v673_v49 = vpack.c.bf16 %v1476_v46, %v1476_v46  ;;  %v686_v51 = vunpack.c.l.b16 %v674_v47 }
 0x414   :  { %v684_v55 = vunpack.c.l.b16 %v672_v48  ;;  %v1358_v48 = vunpack.c.h.bf16 %v1379_v36 }
 0x415   :  { %v685_v58 = vunpack.c.l.b16 %v673_v49 }
 0x417   :  { %v688_v2 = vpack.c.b16 %v685_v58, %v684_v55 }
 0x418   :  { %v1478_v50 = vpop.eup %1477 }
 0x419   :  { %v675_v53 = vpack.c.bf16 %v1478_v50, %v1478_v50 }
 0x41b   :  { %v687_v61 = vunpack.c.l.b16 %v675_v53 }
 0x41d   :  { %v689_v63 = vpack.c.b16 %v687_v61, %v686_v51 }
 0x41f   :  { %752 = vmatpush.bf16.msrb.mxu0 %v689_v63 }
 0x423   :  { %753 = vmatpush.bf16.msrb.mxu0 %v688_v2 }
 0x426   :  { %1271 = vmatmul.msk.bf16.vlgmr.msrb.gmra.mxu0 %vm117_vm0, %v1586_v7 }
 0x428   :  { %v612_v5 = vpop.f32.mrf.mxu2 }
 0x429   :  { %v613_v26 = vadd.f32 %v612_v5, %v1635_v60 }
 0x42b   :  { %1479 = vtanh.f32 %v613_v26 }
 0x430   :  { %v614_v14 = vpop.f32.mrf.mxu2 }
 0x431   :  { %v1871_v15 = vpop.eup %1479  ;;  %v615_v16 = vadd.f32 %v614_v14, %v1639_v1 }
 0x432   :  { %v632_v40 = vsel %vm1867_vm11, %v1871_v15, %v1817_v12  ;;  %v676_v6 = vpack.c.bf16 %v1871_v15, %v1871_v15 }
 0x433   :  { %1481 = vtanh.f32 %v615_v16 }
 0x434   :  { %v696_v24 = vunpack.c.l.b16 %v676_v6 }
 0x436   :  { %1272 = vmatmul.msk.bf16.gmra.mxu0 %vm117_vm0, %v1593_v8 }
 0x438   :  { %v617_v42 = vpop.f32.mrf.mxu2 }
 0x439   :  { %v1880_v18 = vpop.eup %1481  ;;  %v618_v34 = vadd.f32 %v617_v42, %v1637_v62 }
 0x43a   :  { %v633_v54 = vsel %vm1867_vm11, %v1880_v18, %v1829_v17  ;;  %v677_v29 = vpack.c.bf16 %v1880_v18, %v1880_v18 }
 0x43b   :  { %1483 = vtanh.f32 %v618_v34 }
 0x43c   :  { %v697_v31 = vunpack.c.l.b16 %v677_v29 }
 0x43e   :  { %v700_v32 = vpack.c.b16 %v697_v31, %v696_v24 }
 0x440   :  { %v619_v45 = vpop.f32.mrf.mxu2 }
 0x441   :  { %v1887_v0 = vpop.eup %1483  ;;  %v620_v21 = vadd.f32 %v619_v45, %v1650_v13  ;;  %v730_v45 = vsel %vm729_vm12, 1, %v1533_v30 }
 0x442   :  { %v634_v3 = vsel %vm1867_vm11, %v1887_v0, %v1839_v19  ;;  %v678_v23 = vpack.c.bf16 %v1887_v0, %v1887_v0 }
 0x443   :  { %1485 = vtanh.f32 %v620_v21 }
 0x444   :  { %v698_v59 = vunpack.c.l.b16 %v678_v23  ;;  %v731_v23 = vperm.slane %v730_v45, 0 }
 0x446   :  { %vm1923_vm13 = vcmp.eq.s32.totalorder %v731_v23, 1 }
 0x449   :  { %v1896_v25 = vpop.eup %1485 }
 0x44a   :  { %v635_v27 = vsel %vm1867_vm11, %v1896_v25, %v1850_v20  ;;  %v679_v28 = vpack.c.bf16 %v1896_v25, %v1896_v25  ;;  %v1361_v25 = vunpack.c.l.bf16 %v1380_v11 }
 0x44c   :  { %v699_v37 = vunpack.c.l.b16 %v679_v28 }
 0x44e   :  { %v701_v10 = vpack.c.b16 %v699_v37, %v698_v59 }
 0x450   :  { %708 = vmatpush.bf16.msra.mxu3 %v701_v10 }
 0x454   :  { %709 = vmatpush.bf16.msra.mxu3 %v700_v32 }
 0x458   :  { %710 = vmatpush.bf16.msra.mxu3 %v689_v63 }
 0x45c   :  { %711 = vmatpush.bf16.msra.mxu3 %v688_v2 }
 0x45f   :  { %1265 = vmatmul.msk.bf16.vlgmr.msra.gmra.mxu3 %vm193_vm1, %v1620_v56 }
 0x46f   :  { %1266 = vmatmul.msk.bf16.gmra.mxu3 %vm193_vm1, %v1629_v57 }
 0x4a3   :  { %v755_v33 = vpop.f32.mrf.mxu0 }
 0x4a4   :  { %v765_v46 = vadd.f32 %v1353_v22, %v755_v33 }
 0x4ab   :  { %v757_v35 = vpop.f32.mrf.mxu0 }
 0x4ac   :  { %v766_v47 = vadd.f32 %v1354_v43, %v757_v35 }
 0x4b3   :  { %v760_v41 = vpop.f32.mrf.mxu0 }
 0x4b4   :  { %v767_v44 = vadd.f32 %v1357_v39, %v760_v41 }
 0x4b6   :  { %1487 = vtanh.f32 %v767_v44 }
 0x4b7   :  { %1489 = vtanh.f32 %v765_v46 }
 0x4b8   :  { %1491 = vtanh.f32 %v766_v47 }
 0x4bb   :  { %v762_v49 = vpop.f32.mrf.mxu0 }
 0x4bc   :  { %v768_v50 = vadd.f32 %v1358_v48, %v762_v49  ;;  %v1488_v51 = vpop.eup %1487 }
 0x4bd   :  { %v1490_v53 = vpop.eup %1489  ;;  %v775_v55 = vpack.c.bf16 %v1488_v51, %v1488_v51 }
 0x4be   :  { %1493 = vtanh.f32 %v768_v50  ;;  %v1492_v58 = vpop.eup %1491  ;;  %v773_v63 = vpack.c.bf16 %v1490_v53, %v1490_v53  ;;  %v1381_v50 = vld [vmem:[%s2187_s1 + $0x78] sm:$0xff]  }
 0x4bf   :  { %v774_v2 = vpack.c.bf16 %v1492_v58, %v1492_v58  ;;  %v787_v5 = vunpack.c.l.b16 %v775_v55  ;;  %v1365_v51 = vunpack.c.l.bf16 %v1381_v50  ;;  %v1366_v53 = vunpack.c.h.bf16 %v1381_v50 }
 0x4c0   :  { %v785_v9 = vunpack.c.l.b16 %v773_v63 }
 0x4c1   :  { %v786_v14 = vunpack.c.l.b16 %v774_v2 }
 0x4c3   :  { %v789_v42 = vpack.c.b16 %v786_v14, %v785_v9 }
 0x4c4   :  { %v1494_v61 = vpop.eup %1493 }
 0x4c5   :  { %v776_v4 = vpack.c.bf16 %v1494_v61, %v1494_v61 }
 0x4c7   :  { %v788_v26 = vunpack.c.l.b16 %v776_v4 }
 0x4c9   :  { %v790_v16 = vpack.c.b16 %v788_v26, %v787_v5  ;;  %v831_v5 = vsel %vm830_vm14, 1, %v1533_v30 }
 0x4ca   :  { %v832_v14 = vperm.slane %v831_v5, 0 }
 0x4cb   :  { %853 = vmatpush.bf16.msrb.mxu1 %v790_v16 }
 0x4cc   :  { %vm1981_vm15 = vcmp.eq.s32.totalorder %v832_v14, 1 }
 0x4cf   :  { %854 = vmatpush.bf16.msrb.mxu1 %v789_v42 }
 0x4d2   :  { %1279 = vmatmul.msk.bf16.vlgmr.msrb.gmra.mxu1 %vm117_vm0, %v1586_v7 }
 0x4e2   :  { %v713_v34 = vpop.f32.mrf.mxu3  ;;  %1280 = vmatmul.msk.bf16.gmra.mxu1 %vm117_vm0, %v1593_v8  ;;  %vm931_vm0 = vcmp.eq.s32.totalorder %v1680_v52, 7 }
 0x4e3   :  { %v714_v21 = vadd.f32 %v713_v34, %v1635_v60 }
 0x4e5   :  { %1495 = vtanh.f32 %v714_v21 }
 0x4ea   :  { %v715_v29 = vpop.f32.mrf.mxu3 }
 0x4eb   :  { %v1496_v59 = vpop.eup %1495  ;;  %v716_v37 = vadd.f32 %v715_v29, %v1639_v1 }
 0x4ec   :  { %v1935_v7 = vsel %vm1923_vm13, %v1496_v59, %v632_v40  ;;  %v777_v0 = vpack.c.bf16 %v1496_v59, %v1496_v59 }
 0x4ed   :  { %1497 = vtanh.f32 %v716_v37 }
 0x4ee   :  { %v797_v38 = vunpack.c.l.b16 %v777_v0 }
 0x4f2   :  { %v718_v6 = vpop.f32.mrf.mxu3 }
 0x4f3   :  { %v1498_v10 = vpop.eup %1497  ;;  %v719_v31 = vadd.f32 %v718_v6, %v1637_v62 }
 0x4f4   :  { %v1947_v12 = vsel %vm1923_vm13, %v1498_v10, %v633_v54  ;;  %v778_v33 = vpack.c.bf16 %v1498_v10, %v1498_v10 }
 0x4f5   :  { %1499 = vtanh.f32 %v719_v31 }
 0x4fa   :  { %v720_v15 = vpop.f32.mrf.mxu3 }
 0x4fb   :  { %v1500_v40 = vpop.eup %1499  ;;  %v721_v24 = vadd.f32 %v720_v15, %v1650_v13 }
 0x4fc   :  { %v1957_v8 = vsel %vm1923_vm13, %v1500_v40, %v634_v3  ;;  %v779_v17 = vpack.c.bf16 %v1500_v40, %v1500_v40  ;;  %v798_v3 = vunpack.c.l.b16 %v778_v33 }
 0x4fd   :  { %1501 = vtanh.f32 %v721_v24 }
 0x4fe   :  { %v799_v35 = vunpack.c.l.b16 %v779_v17  ;;  %v801_v39 = vpack.c.b16 %v798_v3, %v797_v38 }
 0x503   :  { %v1502_v18 = vpop.eup %1501 }
 0x504   :  { %v1966_v54 = vsel %vm1923_vm13, %v1502_v18, %v635_v27  ;;  %v780_v32 = vpack.c.bf16 %v1502_v18, %v1502_v18  ;;  %v1362_v27 = vunpack.c.h.bf16 %v1380_v11 }
 0x506   :  { %v800_v19 = vunpack.c.l.b16 %v780_v32 }
 0x508   :  { %v802_v36 = vpack.c.b16 %v800_v19, %v799_v35 }
 0x50a   :  { %809 = vmatpush.bf16.msrb.mxu2 %v802_v36 }
 0x50e   :  { %810 = vmatpush.bf16.msrb.mxu2 %v801_v39 }
 0x512   :  { %811 = vmatpush.bf16.msrb.mxu2 %v790_v16 }
 0x516   :  { %812 = vmatpush.bf16.msrb.mxu2 %v789_v42 }
 0x519   :  { %1273 = vmatmul.msk.bf16.vlgmr.msrb.gmra.mxu2 %vm193_vm1, %v1620_v56 }
 0x529   :  { %1274 = vmatmul.msk.bf16.gmra.mxu2 %vm193_vm1, %v1629_v57 }
 0x54f   :  { %v856_v20 = vpop.f32.mrf.mxu1 }
 0x550   :  { %v866_v22 = vadd.f32 %v1361_v25, %v856_v20  ;;  %v1528_v20 = vld [vmem:[%s2190_s4 + $0x8] sm:$0xff]  ;;  %v932_v25 = vsel %vm931_vm0, 1, %v1533_v30 }
 0x552   :  { %1503 = vtanh.f32 %v866_v22 }
 0x557   :  { %v858_v41 = vpop.f32.mrf.mxu1 }
 0x558   :  { %v867_v43 = vadd.f32 %v1362_v27, %v858_v41  ;;  %v1504_v46 = vpop.eup %1503  ;;  %v933_v41 = vperm.slane %v932_v25, 0 }
 0x559   :  { %939 = vst [vmem:[#allocation2 + $0x10] sm:$0xff] %v1504_v46  ;;  %v874_v56 = vpack.c.bf16 %v1504_v46, %v1504_v46 }
 0x55a   :  { %1505 = vtanh.f32 %v867_v43  ;;  %vm2011_vm2 = vcmp.eq.s32.totalorder %v933_v41, 1 }
 0x55b   :  { %v886_v57 = vunpack.c.l.b16 %v874_v56 }
 0x55f   :  { %v861_v44 = vpop.f32.mrf.mxu1 }
 0x560   :  { %v1506_v47 = vpop.eup %1505  ;;  %v868_v61 = vadd.f32 %v1365_v51, %v861_v44 }
 0x561   :  { %940 = vst [vmem:[#allocation2] sm:$0xff] %v1506_v47  ;;  %v875_v48 = vpack.c.bf16 %v1506_v47, %v1506_v47 }
 0x562   :  { %1507 = vtanh.f32 %v868_v61 }
 0x563   :  { %v887_v49 = vunpack.c.l.b16 %v875_v48 }
 0x565   :  { %v890_v55 = vpack.c.b16 %v887_v49, %v886_v57 }
 0x567   :  { %v863_v58 = vpop.f32.mrf.mxu1 }
 0x568   :  { %v869_v63 = vadd.f32 %v1366_v53, %v863_v58  ;;  %v1508_v26 = vpop.eup %1507 }
 0x569   :  { %941 = vst [vmem:[#allocation2 + $0x18] sm:$0xff] %v1508_v26  ;;  %v876_v19 = vpack.c.bf16 %v1508_v26, %v1508_v26 }
 0x56a   :  { %1509 = vtanh.f32 %v869_v63 }
 0x570   :  { %v1510_v9 = vpop.eup %1509 }
 0x571   :  { %942 = vst [vmem:[#allocation2 + $0x8] sm:$0xff] %v1510_v9  ;;  %v877_v0 = vpack.c.bf16 %v1510_v9, %v1510_v9 }
 0x573   :  { %v889_v38 = vunpack.c.l.b16 %v877_v0 }
 0x59c   :  { %v814_v2 = vpop.f32.mrf.mxu2 }
 0x59d   :  { %v815_v4 = vadd.f32 %v814_v2, %v1635_v60 }
 0x59f   :  { %1511 = vtanh.f32 %v815_v4 }
 0x5a4   :  { %v816_v42 = vpop.f32.mrf.mxu2 }
 0x5a5   :  { %v1512_v34 = vpop.eup %1511  ;;  %v817_v45 = vadd.f32 %v816_v42, %v1639_v1 }
 0x5a6   :  { %v834_v21 = vsel %vm1981_vm15, %v1512_v34, %v1935_v7  ;;  %v878_v32 = vpack.c.bf16 %v1512_v34, %v1512_v34 }
 0x5a7   :  { %1513 = vtanh.f32 %v817_v45 }
 0x5a8   :  { %v898_v36 = vunpack.c.l.b16 %v878_v32 }
 0x5ac   :  { %v819_v23 = vpop.f32.mrf.mxu2 }
 0x5ad   :  { %v1514_v28 = vpop.eup %1513  ;;  %v820_v29 = vadd.f32 %v819_v23, %v1637_v62 }
 0x5ae   :  { %v835_v59 = vsel %vm1981_vm15, %v1514_v28, %v1947_v12  ;;  %v879_v17 = vpack.c.bf16 %v1514_v28, %v1514_v28 }
 0x5af   :  { %1515 = vtanh.f32 %v820_v29 }
 0x5b0   :  { %v899_v35 = vunpack.c.l.b16 %v879_v17 }
 0x5b2   :  { %v902_v3 = vpack.c.b16 %v899_v35, %v898_v36 }
 0x5b4   :  { %v821_v37 = vpop.f32.mrf.mxu2 }
 0x5b5   :  { %v1516_v6 = vpop.eup %1515  ;;  %v822_v10 = vadd.f32 %v821_v37, %v1650_v13 }
 0x5b6   :  { %v836_v31 = vsel %vm1981_vm15, %v1516_v6, %v1957_v8  ;;  %v880_v7 = vpack.c.bf16 %v1516_v6, %v1516_v6  ;;  %v888_v8 = vunpack.c.l.b16 %v876_v19 }
 0x5b7   :  { %1517 = vtanh.f32 %v822_v10 }
 0x5b8   :  { %v900_v18 = vunpack.c.l.b16 %v880_v7  ;;  %v891_v39 = vpack.c.b16 %v889_v38, %v888_v8 }
 0x5bd   :  { %v1518_v15 = vpop.eup %1517 }
 0x5be   :  { %v837_v40 = vsel %vm1981_vm15, %v1518_v15, %v1966_v54  ;;  %v881_v24 = vpack.c.bf16 %v1518_v15, %v1518_v15  ;;  %v1527_v54 = vld [vmem:[%s2190_s4] sm:$0xff] }
 0x5c0   :  { %v901_v12 = vunpack.c.l.b16 %v881_v24 }
 0x5c2   :  { %v903_v33 = vpack.c.b16 %v901_v12, %v900_v18 }
 0x5c4   :  { %910 = vmatpush.bf16.msrb.mxu3 %v903_v33 }
 0x5c8   :  { %911 = vmatpush.bf16.msrb.mxu3 %v902_v3 }
 0x5cc   :  { %912 = vmatpush.bf16.msrb.mxu3 %v891_v39 }
 0x5d0   :  { %913 = vmatpush.bf16.msrb.mxu3 %v890_v55 }
 0x5d3   :  { %1281 = vmatmul.msk.bf16.vlgmr.msrb.gmra.mxu3 %vm193_vm1, %v1527_v54 }
 0x5e3   :  { %1282 = vmatmul.msk.bf16.gmra.mxu3 %vm193_vm1, %v1528_v20 }
 0x656   :  { %v915_v11 = vpop.f32.mrf.mxu3 }
 0x657   :  { %v916_v27 = vadd.f32 %v915_v11, %v1635_v60 }
 0x659   :  { %1519 = vtanh.f32 %v916_v27 }
 0x65e   :  { %v917_v43 = vpop.f32.mrf.mxu3 }
 0x65f   :  { %v1520_v44 = vpop.eup %1519  ;;  %v918_v46 = vadd.f32 %v917_v43, %v1639_v1 }
 0x660   :  { %v935_v47 = vsel %vm2011_vm2, %v1520_v44, %v834_v21  ;;  %943 = vst [vmem:[#allocation3] sm:$0xff] %v1520_v44 }
 0x661   :  { %947 = vst [vmem:[#allocation4] sm:$0xff] %v935_v47  ;;  %1521 = vtanh.f32 %v918_v46 }
 0x666   :  { %v920_v52 = vpop.f32.mrf.mxu3 }
 0x667   :  { %v1522_v30 = vpop.eup %1521  ;;  %v921_v60 = vadd.f32 %v920_v52, %v1637_v62 }
 0x668   :  { %v936_v56 = vsel %vm2011_vm2, %v1522_v30, %v835_v59  ;;  %944 = vst [vmem:[#allocation3 + $0x18] sm:$0xff] %v1522_v30 }
 0x669   :  { %948 = vst [vmem:[#allocation4 + $0x8] sm:$0xff] %v936_v56  ;;  %1523 = vtanh.f32 %v921_v60 }
 0x66e   :  { %v922_v48 = vpop.f32.mrf.mxu3 }
 0x66f   :  { %v1524_v57 = vpop.eup %1523  ;;  %v923_v1 = vadd.f32 %v922_v48, %v1650_v13 }
 0x670   :  { %v937_v49 = vsel %vm2011_vm2, %v1524_v57, %v836_v31  ;;  %945 = vst [vmem:[#allocation3 + $0x8] sm:$0xff] %v1524_v57 }
 0x671   :  { %949 = vst [vmem:[#allocation4 + $0x10] sm:$0xff] %v937_v49  ;;  %1525 = vtanh.f32 %v923_v1 }
 0x677   :  { %v1526_v50 = vpop.eup %1525 }
 0x678   :  { %v938_v62 = vsel %vm2011_vm2, %v1526_v50, %v837_v40  ;;  %946 = vst [vmem:[#allocation3 + $0x10] sm:$0xff] %v1526_v50 }
 0x679   :  { %950 = vst [vmem:[#allocation4 + $0x18] sm:$0xff] %v938_v62 }
 0x67a PF:  { %v1534_v53 = vmov 0   ;;  %v976_v13 = vld [vmem:[%s2193_s7 + $0x10] sm:$0xff]  ;;  %v974_v55 = vld [vmem:[%s2193_s7] sm:$0xff]  ;;  %vm1070_vm1 = vcmask 261120   ;;  %v977_v14 = vld [vmem:[%s2193_s7 + $0x18] sm:$0xff] }
 0x67b   :  { %1530 = vset.pattern.permute.xlu1 %v1534_v53  ;;  %1529 = vset.pattern.permute.xlu0 %v1534_v53  ;;  %v954_v2 = vld [vmem:[%s2192_s6] sm:$0xff]  ;;  %v975_v16 = vld [vmem:[%s2193_s7 + $0x8] sm:$0xff]  ;;  %v981_v28 = vld [vmem:[%s2193_s7 + $0x38] sm:$0xff] }
 0x67c   :  { %1002 = vperm.xlu1 %1530, %v976_v13   ;;  %992 = vperm.xlu0 %1529, %v974_v55   ;;  %v958_v5 = vld [vmem:[%s2192_s6 + $0x20] sm:$0xff]  ;;  %v955_v42 = vld [vmem:[%s2192_s6 + $0x8] sm:$0xff]  ;;  %v980_v29 = vld [vmem:[%s2193_s7 + $0x30] sm:$0xff] }
 0x67d   :  { %v970_v63 = vld [vmem:[#allocation4] sm:$0xff]  ;;  %1531 = vset.pattern.permute.xlu2 %v1534_v53  ;;  %v959_v34 = vld [vmem:[%s2192_s6 + $0x28] sm:$0xff]  ;;  %v956_v59 = vld [vmem:[%s2192_s6 + $0x10] sm:$0xff] }
 0x67e   :  { %v971_v61 = vld [vmem:[#allocation4 + $0x8] sm:$0xff]  ;;  %v962_v4 = vld [vmem:[%s2192_s6 + $0x40] sm:$0xff]  ;;  %v960_v37 = vld [vmem:[%s2192_s6 + $0x30] sm:$0xff] }
 0x67f   :  { %v972_v58 = vld [vmem:[#allocation4 + $0x10] sm:$0xff]  ;;  %v966_v26 = vld [vmem:[%s2192_s6 + $0x60] sm:$0xff]  ;;  %v963_v45 = vld [vmem:[%s2192_s6 + $0x48] sm:$0xff] }
 0x680   :  { %v973_v51 = vld [vmem:[#allocation4 + $0x18] sm:$0xff]  ;;  %v978_v9 = vld [vmem:[%s2193_s7 + $0x20] sm:$0xff]  ;;  %v967_v21 = vld [vmem:[%s2192_s6 + $0x68] sm:$0xff] }
 0x681   :  { %1131 = vmatpush.msra.mxu0 %v973_v51  ;;  %1382 = vmatpush.msra.mxu1 %v973_v51  ;;  %v979_v23 = vld [vmem:[%s2193_s7 + $0x28] sm:$0xff]  ;;  %v964_v6 = vld [vmem:[%s2192_s6 + $0x50] sm:$0xff]  ;;  %v982_v31 = vld [vmem:[%s2193_s7 + $0x40] sm:$0xff] }
 0x682   :  { %1383 = vmatpush.msra.mxu2 %v973_v51  ;;  %1384 = vmatpush.msra.mxu3 %v973_v51  ;;  %v968_v10 = vld [vmem:[%s2192_s6 + $0x70] sm:$0xff]  ;;  %v983_v15 = vld [vmem:[%s2193_s7 + $0x48] sm:$0xff]  ;;  %v957_v40 = vld [vmem:[%s2192_s6 + $0x18] sm:$0xff] }
 0x683   :  { %1132 = vmatpush.msra.mxu0 %v972_v58  ;;  %1385 = vmatpush.msra.mxu1 %v972_v58  ;;  %v984_v7 = vld [vmem:[%s2193_s7 + $0x50] sm:$0xff]  ;;  %v961_v24 = vld [vmem:[%s2192_s6 + $0x38] sm:$0xff]  ;;  %v987_v32 = vld [vmem:[%s2193_s7 + $0x68] sm:$0xff] }
 0x684   :  { %1386 = vmatpush.msra.mxu2 %v972_v58  ;;  %1387 = vmatpush.msra.mxu3 %v972_v58  ;;  %v965_v17 = vld [vmem:[%s2192_s6 + $0x58] sm:$0xff]  ;;  %v986_v33 = vld [vmem:[%s2193_s7 + $0x60] sm:$0xff]  ;;  %v988_v35 = vld [vmem:[%s2193_s7 + $0x70] sm:$0xff] }
 0x685   :  { %1133 = vmatpush.msra.mxu0 %v971_v61  ;;  %1388 = vmatpush.msra.mxu1 %v971_v61  ;;  %v969_v18 = vld [vmem:[%s2192_s6 + $0x78] sm:$0xff] }
 0x686   :  { %1389 = vmatpush.msra.mxu2 %v971_v61  ;;  %1390 = vmatpush.msra.mxu3 %v971_v61  ;;  %v985_v12 = vld [vmem:[%s2193_s7 + $0x58] sm:$0xff] }
 0x687   :  { %1134 = vmatpush.msra.mxu0 %v970_v63  ;;  %1391 = vmatpush.msra.mxu1 %v970_v63  ;;  %v989_v19 = vld [vmem:[%s2193_s7 + $0x78] sm:$0xff] }
 0x688   :  { %1392 = vmatpush.msra.mxu2 %v970_v63  ;;  %1393 = vmatpush.msra.mxu3 %v970_v63 }
 0x689   :  { %1283 = vmatmul.msk.f32.vlgmr.msra.gmra.mxu0 %vm1070_vm1, %v954_v2  ;;  %1287 = vmatmul.msk.f32.vlgmr.msra.gmra.mxu1 %vm1070_vm1, %v958_v5 }
 0x68a   :  { %1291 = vmatmul.msk.f32.vlgmr.msra.gmra.mxu2 %vm1070_vm1, %v962_v4  ;;  %1295 = vmatmul.msk.f32.vlgmr.msra.gmra.mxu3 %vm1070_vm1, %v966_v26 }
 0x68b   :  { %1012 = vperm.xlu2 %1531, %v978_v9   ;;  %1007 = vperm.xlu1 %1530, %v977_v14  }
 0x68c   :  { %997 = vperm.xlu0 %1529, %v975_v16  }
 0x691   :  { %1284 = vmatmul.msk.f32.gmra.mxu0 %vm1070_vm1, %v955_v42  ;;  %1288 = vmatmul.msk.f32.gmra.mxu1 %vm1070_vm1, %v959_v34 }
 0x692   :  { %1292 = vmatmul.msk.f32.gmra.mxu2 %vm1070_vm1, %v963_v45  ;;  %1296 = vmatmul.msk.f32.gmra.mxu3 %vm1070_vm1, %v967_v21 }
 0x693   :  { %1017 = vperm.xlu2 %1531, %v979_v23   ;;  %1027 = vperm.xlu1 %1530, %v981_v28  }
 0x694   :  { %1022 = vperm.xlu0 %1529, %v980_v29  }
 0x699   :  { %1285 = vmatmul.msk.f32.gmra.mxu0 %vm1070_vm1, %v956_v59  ;;  %1289 = vmatmul.msk.f32.gmra.mxu1 %vm1070_vm1, %v960_v37 }
 0x69a   :  { %1293 = vmatmul.msk.f32.gmra.mxu2 %vm1070_vm1, %v964_v6  ;;  %1297 = vmatmul.msk.f32.gmra.mxu3 %vm1070_vm1, %v968_v10 }
 0x69b   :  { %1032 = vperm.xlu2 %1531, %v982_v31   ;;  %1042 = vperm.xlu1 %1530, %v984_v7  }
 0x69c   :  { %1037 = vperm.xlu0 %1529, %v983_v15  }
 0x6a1   :  { %1286 = vmatmul.msk.f32.gmra.mxu0 %vm1070_vm1, %v957_v40  ;;  %1290 = vmatmul.msk.f32.gmra.mxu1 %vm1070_vm1, %v961_v24 }
 0x6a2   :  { %1294 = vmatmul.msk.f32.gmra.mxu2 %vm1070_vm1, %v965_v17  ;;  %1298 = vmatmul.msk.f32.gmra.mxu3 %vm1070_vm1, %v969_v18 }
 0x6a3   :  { %1047 = vperm.xlu2 %1531, %v985_v12   ;;  %1057 = vperm.xlu1 %1530, %v987_v32  }
 0x6a4   :  { %1052 = vperm.xlu0 %1529, %v986_v33  }
 0x6ab   :  { %1062 = vperm.xlu2 %1531, %v988_v35  }
 0x6ac   :  { %1067 = vperm.xlu0 %1529, %v989_v19  }
 0x6e5   :  { %v1013_v3 = vpop.permute.xlu2 %1012 }
 0x6ed   :  { %v1018_v39 = vpop.permute.xlu2 %1017 }
 0x6ee   :  { %v1003_v0 = vpop.permute.xlu1 %1002  ;;  %v993_v36 = vpop.permute.xlu0 %992 }
 0x6f5   :  { %v1033_v22 = vpop.permute.xlu2 %1032 }
 0x6fd   :  { %v1008_v8 = vpop.permute.xlu1 %1007  ;;  %v1048_v57 = vpop.permute.xlu2 %1047 }
 0x6fe   :  { %v998_v38 = vpop.permute.xlu0 %997 }
 0x705   :  { %v1028_v54 = vpop.permute.xlu1 %1027  ;;  %v1063_v5 = vpop.permute.xlu2 %1062 }
 0x706   :  { %v1023_v20 = vpop.permute.xlu0 %1022  ;;  %v1136_v11 = vpop.f32.mrf.mxu0 }
 0x707   :  { %v1148_v25 = vpop.f32.mrf.mxu1  ;;  %v1137_v27 = vadd.f32 %v1136_v11, %v993_v36 }
 0x708   :  { %v1149_v41 = vadd.f32 %v1148_v25, %v1013_v3 }
 0x709   :  { %1184 = vst [vmem:[%s2194_s8] sm:$0xff] %v1137_v27 }
 0x70a   :  { %1188 = vst [vmem:[%s2194_s8 + $0x20] sm:$0xff] %v1149_v41 }
 0x70d   :  { %v1160_v43 = vpop.f32.mrf.mxu2  ;;  %v1172_v46 = vpop.f32.mrf.mxu3 }
 0x70e   :  { %v1161_v44 = vadd.f32 %v1160_v43, %v1033_v22  ;;  %v1043_v47 = vpop.permute.xlu1 %1042  ;;  %v1038_v52 = vpop.permute.xlu0 %1037 }
 0x70f   :  { %v1139_v30 = vpop.f32.mrf.mxu0  ;;  %v1151_v56 = vpop.f32.mrf.mxu1 }
 0x710   :  { %1192 = vst [vmem:[%s2194_s8 + $0x40] sm:$0xff] %v1161_v44  ;;  %v1140_v60 = vadd.f32 %v1139_v30, %v998_v38  ;;  %v1152_v48 = vadd.f32 %v1151_v56, %v1018_v39 }
 0x712   :  { %1185 = vst [vmem:[%s2194_s8 + $0x8] sm:$0xff] %v1140_v60 }
 0x713   :  { %1189 = vst [vmem:[%s2194_s8 + $0x28] sm:$0xff] %v1152_v48 }
 0x715   :  { %v1163_v1 = vpop.f32.mrf.mxu2  ;;  %v1175_v50 = vpop.f32.mrf.mxu3 }
 0x716   :  { %v1164_v49 = vadd.f32 %v1163_v1, %v1038_v52  ;;  %v1058_v62 = vpop.permute.xlu1 %1057  ;;  %v1053_v53 = vpop.permute.xlu0 %1052 }
 0x717   :  { %v1176_v51 = vadd.f32 %v1175_v50, %v1058_v62  ;;  %v1142_v13 = vpop.f32.mrf.mxu0  ;;  %v1173_v55 = vadd.f32 %v1172_v46, %v1053_v53  ;;  %v1154_v61 = vpop.f32.mrf.mxu1 }
 0x718   :  { %1193 = vst [vmem:[%s2194_s8 + $0x48] sm:$0xff] %v1164_v49  ;;  %v1143_v58 = vadd.f32 %v1142_v13, %v1003_v0  ;;  %v1155_v63 = vadd.f32 %v1154_v61, %v1023_v20 }
 0x719   :  { %1197 = vst [vmem:[%s2194_s8 + $0x68] sm:$0xff] %v1176_v51 }
 0x71a   :  { %1196 = vst [vmem:[%s2194_s8 + $0x60] sm:$0xff] %v1173_v55 }
 0x71b   :  { %1186 = vst [vmem:[%s2194_s8 + $0x10] sm:$0xff] %v1143_v58 }
 0x71c   :  { %1190 = vst [vmem:[%s2194_s8 + $0x30] sm:$0xff] %v1155_v63 }
 0x71d   :  { %v1166_v2 = vpop.f32.mrf.mxu2  ;;  %v1178_v26 = vpop.f32.mrf.mxu3 }
 0x71e   :  { %v1167_v4 = vadd.f32 %v1166_v2, %v1043_v47  ;;  %v1179_v9 = vadd.f32 %v1178_v26, %v1063_v5  ;;  %v1068_v21 = vpop.permute.xlu0 %1067 }
 0x71f   :  { %v1145_v14 = vpop.f32.mrf.mxu0  ;;  %v1157_v42 = vpop.f32.mrf.mxu1 }
 0x720   :  { %1194 = vst [vmem:[%s2194_s8 + $0x50] sm:$0xff] %v1167_v4  ;;  %v1146_v16 = vadd.f32 %v1145_v14, %v1008_v8  ;;  %v1158_v34 = vadd.f32 %v1157_v42, %v1028_v54 }
 0x721   :  { %1198 = vst [vmem:[%s2194_s8 + $0x70] sm:$0xff] %v1179_v9 }
 0x722   :  { %1187 = vst [vmem:[%s2194_s8 + $0x18] sm:$0xff] %v1146_v16 }
 0x723   :  { %1191 = vst [vmem:[%s2194_s8 + $0x38] sm:$0xff] %v1158_v34 }
 0x725   :  { %v1169_v45 = vpop.f32.mrf.mxu2  ;;  %v1181_v28 = vpop.f32.mrf.mxu3 }
 0x726   :  { %v1170_v23 = vadd.f32 %v1169_v45, %v1048_v57  ;;  %v1182_v29 = vadd.f32 %v1181_v28, %v1068_v21 }
 0x728   :  { %1195 = vst [vmem:[%s2194_s8 + $0x58] sm:$0xff] %v1170_v23 }
 0x729   :  { %1199 = vst [vmem:[%s2194_s8 + $0x78] sm:$0xff] %v1182_v29 }

</bundles_post_ra>
